<compile_context>
chip_gen: v6e
topology: v6e:2x2x1
jax: 0.10.0
libtpu: 0.0.40
codegen_flags: <defaults>
</compile_context>

<pallas_src>
import functools

import jax
import jax.numpy as jnp
from jax import lax
from jax.experimental import pallas as pl
from jax.experimental.pallas import tpu as pltpu

_NEG_BIG = -1e30


def _round_up(x, m):
    return ((x + m - 1) // m) * m


def _clip_loss_kernel(txt_resident, tile_n,
                      nvalid_ref, img_ref, txt_ref,
                      lbl_row_ref, lbl_col_ref, winv_row_ref, winv_col_ref,
                      out_ref,
                      row_m, row_l, row_msum,
                      col_m, col_l, col_msum,
                      loss_acc):
    r = pl.program_id(0)          # row-tile index of the logit matrix
    c = pl.program_id(1)          # column-tile index (innermost)
    nr = pl.num_programs(0)
    nc = pl.num_programs(1)

    tile_m = img_ref.shape[0]
    n_valid = nvalid_ref[0, 0]

    col_start = pl.multiple_of(c * tile_n, tile_n)
    cs = pl.ds(col_start, tile_n)

    # ------------------------- init ------------------------------------------
    @pl.when(jnp.logical_and(r == 0, c == 0))
    def _():
        loss_acc[0, 0] = 0.0
        # Full-width init of all column-direction stats in one shot.
        col_m[...] = jnp.full_like(col_m, _NEG_BIG)
        col_l[...] = jnp.zeros_like(col_l)
        col_msum[...] = jnp.zeros_like(col_msum)

    @pl.when(c == 0)      # new row tile: reset row-direction (image-side) stats
    def _():
        row_m[...] = jnp.full_like(row_m, _NEG_BIG)
        row_l[...] = jnp.zeros_like(row_l)
        row_msum[...] = jnp.zeros_like(row_msum)

    # -------- single bf16 MXU matmul (inputs pre-normalized, scale pre-folded) --
    img = img_ref[...]                                            # (tm, D) bf16
    if txt_resident:
        txt = txt_ref[pl.ds(col_start, tile_n), :]                # slice resident txt
    else:
        txt = txt_ref[...]                                        # (tn, D) bf16
    logits = lax.dot_general(img, txt, (((1,), (1,)), ((), ())),
                             preferred_element_type=jnp.float32)   # (tm, tn) f32

    # -------- validity masks / soft-target bookkeeping (no eq / targets mats) --
    row_ids = r * tile_m + lax.broadcasted_iota(jnp.int32, (tile_m, 1), 0)
    col_ids = col_start + lax.broadcasted_iota(jnp.int32, (1, tile_n), 1)
    row_valid = row_ids < n_valid                                  # (tm, 1)
    col_valid = col_ids < n_valid                                  # (1, tn)
    valid = jnp.logical_and(row_valid, col_valid)                  # (tm, tn)

    lm = jnp.where(valid, logits, _NEG_BIG)
    eq_logits = jnp.where(
        jnp.logical_and(lbl_row_ref[...] == lbl_col_ref[...], valid), logits, 0.0)

    # -------- image side: online row LSE + matched-logit row sums -------------
    m_prev = row_m[...]
    m_new = jnp.maximum(m_prev, jnp.max(lm, axis=-1, keepdims=True))
    row_l[...] = (jnp.exp(m_prev - m_new) * row_l[...]
                  + jnp.sum(jnp.exp(lm - m_new), axis=-1, keepdims=True))
    row_m[...] = m_new
    row_msum[...] += jnp.sum(eq_logits, axis=-1, keepdims=True)

    # -------- text side (logits_per_text == logits.T): column-direction stats --
    cm_prev = col_m[:, cs]
    cm_new = jnp.maximum(cm_prev, jnp.max(lm, axis=0, keepdims=True))
    col_l[:, cs] = (jnp.exp(cm_prev - cm_new) * col_l[:, cs]
                    + jnp.sum(jnp.exp(lm - cm_new), axis=0, keepdims=True))
    col_m[:, cs] = cm_new
    col_msum[:, cs] += jnp.sum(eq_logits, axis=0, keepdims=True)

    # -------- finalize image-side CE for this row tile -------------------------
    @pl.when(c == nc - 1)
    def _():
        ce = row_m[...] + jnp.log(row_l[...]) - row_msum[...] * winv_row_ref[...]
        loss_acc[0, 0] += jnp.sum(jnp.where(row_valid, ce, 0.0))

    # -------- finalize text-side CE for this column tile -----------------------
    @pl.when(r == nr - 1)
    def _():
        ce = col_m[:, cs] + jnp.log(col_l[:, cs]) - col_msum[:, cs] * winv_col_ref[...]
        loss_acc[0, 0] += jnp.sum(jnp.where(col_valid, ce, 0.0))

    # -------- final normalization (last grid step) ------------------------------
    @pl.when(jnp.logical_and(r == nr - 1, c == nc - 1))
    def _():
        final = 0.5 * loss_acc[0, 0] / n_valid.astype(jnp.float32)
        out_ref[...] = jnp.full((1, 1), final, dtype=jnp.float32)


def clip_loss(image_features, text_features, ground_labels, logit_scale=1.0,
              *, tile_m=512, tile_n=256, txt_resident_bytes=12 * 1024 * 1024):
    """Pallas ClipLoss forward (world_size=1). Returns a scalar f32 loss."""
    n, d = image_features.shape
    f32 = jnp.float32
    bf16 = jnp.bfloat16

    # ---- tile geometry (tile_m decoupled from tile_n; both divide n_pad) ------
    tile_n = _round_up(min(tile_n, _round_up(n, 128)), 128)
    tile_m = _round_up(max(tile_m, tile_n), tile_n)
    tile_m = min(tile_m, _round_up(n, tile_n))
    n_pad = _round_up(n, tile_m)
    d_pad = _round_up(d, 128)

    # ---- normalize + fold logit_scale ONCE, cast to bf16, fuse with padding ---
    img32 = image_features.astype(f32)
    txt32 = text_features.astype(f32)
    # torch F.normalize(p=2, eps=1e-12): x / max(||x||, eps)
    img_inv = jnp.minimum(lax.rsqrt(jnp.sum(img32 * img32, axis=-1, keepdims=True)), 1e12)
    txt_inv = jnp.minimum(lax.rsqrt(jnp.sum(txt32 * txt32, axis=-1, keepdims=True)), 1e12)
    img_n = (img32 * (img_inv * logit_scale)).astype(bf16)
    txt_n = (txt32 * txt_inv).astype(bf16)

    labels = ground_labels.astype(jnp.int32).reshape(n)
    # Precompute per-sample match counts (drops in-kernel cnt reductions).
    cnt = jnp.sum((labels[:, None] == labels[None, :]).astype(jnp.int32), axis=-1)
    winv = 1.0 / cnt.astype(f32)

    if (n_pad, d_pad) != (n, d):
        img_n = jnp.zeros((n_pad, d_pad), bf16).at[:n, :d].set(img_n)
        txt_n = jnp.zeros((n_pad, d_pad), bf16).at[:n, :d].set(txt_n)
    if n_pad != n:
        labels = jnp.full((n_pad,), -1, jnp.int32).at[:n].set(labels)
        winv = jnp.zeros((n_pad,), f32).at[:n].set(winv)

    nvalid = jnp.full((1, 1), n, jnp.int32)

    # ---- text placement: VMEM-resident (read from HBM once) or streamed tiles --
    txt_resident = (n_pad * d_pad * 2) <= txt_resident_bytes
    if txt_resident:
        txt_spec = pl.BlockSpec((n_pad, d_pad), lambda r, c: (0, 0))
    else:
        # TODO(synk): consider pipeline_mode=pl.Buffered(3) here when VMEM allows.
        txt_spec = pl.BlockSpec((tile_n, d_pad), lambda r, c: (c, 0))

    grid = (n_pad // tile_m, n_pad // tile_n)

    out = pl.pallas_call(
        functools.partial(_clip_loss_kernel, txt_resident, tile_n),
        out_shape=jax.ShapeDtypeStruct((1, 1), f32),
        grid_spec=pltpu.PrefetchScalarGridSpec(
            num_scalar_prefetch=0,
            grid=grid,
            in_specs=[
                pl.BlockSpec(memory_space=pltpu.MemorySpace.SMEM),    # n_valid scalar
                pl.BlockSpec((tile_m, d_pad), lambda r, c: (r, 0)),   # image row tile (bf16)
                txt_spec,                                             # text (bf16)
                pl.BlockSpec((tile_m, 1), lambda r, c: (r, 0)),       # labels (rows)
                pl.BlockSpec((1, tile_n), lambda r, c: (0, c)),       # labels (cols)
                pl.BlockSpec((tile_m, 1), lambda r, c: (r, 0)),       # 1/cnt (rows)
                pl.BlockSpec((1, tile_n), lambda r, c: (0, c)),       # 1/cnt (cols)
            ],
            out_specs=pl.BlockSpec((1, 1), lambda r, c: (0, 0)),
            scratch_shapes=[
                pltpu.VMEM((tile_m, 1), f32),   # row_m
                pltpu.VMEM((tile_m, 1), f32),   # row_l
                pltpu.VMEM((tile_m, 1), f32),   # row_msum
                pltpu.VMEM((1, n_pad), f32),    # col_m
                pltpu.VMEM((1, n_pad), f32),    # col_l
                pltpu.VMEM((1, n_pad), f32),    # col_msum
                pltpu.SMEM((1, 1), f32),        # scalar loss accumulator
            ],
        ),
        compiler_params=pltpu.CompilerParams(
            # Column-stat accumulators span row tiles, so both axes are sequential.
            dimension_semantics=("arbitrary", "arbitrary"),
            vmem_limit_bytes=48 * 1024 * 1024,   # safe on v5e/v6e (128 MiB) and v7x (64 MiB)
        ),
    )(nvalid, img_n, txt_n,
      labels.reshape(n_pad, 1), labels.reshape(1, n_pad),
      winv.reshape(n_pad, 1), winv.reshape(1, n_pad))
    return out[0, 0]


def _ref_clip_loss(image_features, text_features, ground_labels, logit_scale=1.0):
    """Pure-JAX f32 reference mirroring the PyTorch module (world_size=1)."""
    img_n = image_features / jnp.maximum(
        jnp.linalg.norm(image_features, axis=-1, keepdims=True), 1e-12)
    txt_n = text_features / jnp.maximum(
        jnp.linalg.norm(text_features, axis=-1, keepdims=True), 1e-12)
    logits_img = logit_scale * img_n @ txt_n.T
    logits_txt = logit_scale * txt_n @ img_n.T
    eq = (ground_labels[:, None] == ground_labels[None, :]).astype(jnp.float32)
    targets = eq / jnp.sum(eq, axis=-1, keepdims=True)

    def ce(l):
        return -jnp.mean(jnp.sum(targets * jax.nn.log_softmax(l, axis=-1), axis=-1))

    return 0.5 * (ce(logits_img) + ce(logits_txt))


def _ref_clip_loss_bf16(image_features, text_features, ground_labels, logit_scale=1.0):
    """Reference matching the kernel's bf16-matmul numerics."""
    def inv_norm(x):
        return jnp.minimum(lax.rsqrt(jnp.sum(x * x, axis=-1, keepdims=True)), 1e12)
    a = (image_features * (inv_norm(image_features) * logit_scale)).astype(jnp.bfloat16)
    b = (text_features * inv_norm(text_features)).astype(jnp.bfloat16)
    logits = jnp.dot(a, b.T, preferred_element_type=jnp.float32)
    eq = (ground_labels[:, None] == ground_labels[None, :]).astype(jnp.float32)
    targets = eq / jnp.sum(eq, axis=-1, keepdims=True)

    def ce(l):
        return -jnp.mean(jnp.sum(targets * jax.nn.log_softmax(l, axis=-1), axis=-1))

    return 0.5 * (ce(logits) + ce(logits.T))


if __name__ == "__main__":
    key = jax.random.PRNGKey(0)
    k_img, k_txt, k_lbl = jax.random.split(key, 3)

    # Small but non-trivial: exercises N-padding (200 -> 256), D-padding (48 -> 128)
    # and a 2x2 tile grid.
    N, D = 200, 48
    image_features = jax.random.normal(k_img, (N, D), dtype=jnp.float32)
    text_features = jax.random.normal(k_txt, (N, D), dtype=jnp.float32)
    ground_labels = jax.random.randint(k_lbl, (N,), 0, 4, dtype=jnp.int32)
    logit_scale = 2.5

    # Resident-text path.
    loss = clip_loss(image_features, text_features, ground_labels, logit_scale,
                     tile_m=128, tile_n=128)
    loss = jax.block_until_ready(loss)

    # Streamed-text path (forced by txt_resident_bytes=0).
    loss_stream = clip_loss(image_features, text_features, ground_labels, logit_scale,
                            tile_m=128, tile_n=128, txt_resident_bytes=0)
    loss_stream = jax.block_until_ready(loss_stream)

    ref_bf16 = jax.block_until_ready(
        _ref_clip_loss_bf16(image_features, text_features, ground_labels, logit_scale))
    ref_f32 = jax.block_until_ready(
        _ref_clip_loss(image_features, text_features, ground_labels, logit_scale))

    assert jnp.isfinite(loss) and jnp.isfinite(loss_stream), "loss is not finite"
    # Tight check against a reference with matched bf16-matmul numerics.
    assert jnp.allclose(loss, ref_bf16, rtol=2e-3, atol=2e-3), (loss, ref_bf16)
    assert jnp.allclose(loss_stream, ref_bf16, rtol=2e-3, atol=2e-3), (loss_stream, ref_bf16)
    # Looser check against the torch-faithful f32 reference (bf16 MXU inputs).
    assert jnp.allclose(loss, ref_f32, rtol=2e-2, atol=2e-2), (loss, ref_f32)

    print("KERNEL_OK")
</pallas_src>

<mosaic_0001>
module attributes {stable_mosaic.version = 11 : i64} {
  func.func @_clip_loss_kernel(%arg0: i32, %arg1: i32, %arg2: memref<1x1xi32, #tpu.memory_space<smem>>, %arg3: memref<128x128xbf16, #tpu.memory_space<vmem>>, %arg4: memref<256x128xbf16, #tpu.memory_space<vmem>>, %arg5: memref<128x1xi32, #tpu.memory_space<vmem>>, %arg6: memref<1x128xi32, #tpu.memory_space<vmem>>, %arg7: memref<128x1xf32, #tpu.memory_space<vmem>>, %arg8: memref<1x128xf32, #tpu.memory_space<vmem>>, %arg9: memref<1x1xf32, #tpu.memory_space<vmem>>, %arg10: memref<128x1xf32, #tpu.memory_space<vmem>>, %arg11: memref<128x1xf32, #tpu.memory_space<vmem>>, %arg12: memref<128x1xf32, #tpu.memory_space<vmem>>, %arg13: memref<1x256xf32, #tpu.memory_space<vmem>>, %arg14: memref<1x256xf32, #tpu.memory_space<vmem>>, %arg15: memref<1x256xf32, #tpu.memory_space<vmem>>, %arg16: memref<1x1xf32, #tpu.memory_space<smem>>) attributes {dimension_semantics = [#tpu.dimension_semantics<arbitrary>, #tpu.dimension_semantics<arbitrary>], iteration_bounds = array<i64: 2, 2>, scalar_prefetch = 0 : i64, scratch_operands = 7 : i64, tpu.core_type = #tpu.core_type<tc>, window_params = [{transform_indices = @transform_0, window_bounds = array<i64: 1, 1>}, {transform_indices = @transform_1, window_bounds = array<i64: 128, 128>}, {pipeline_mode = #tpu.pipeline_mode<synchronous>, transform_indices = @transform_2, window_bounds = array<i64: 256, 128>}, {transform_indices = @transform_3, window_bounds = array<i64: 128, 1>}, {transform_indices = @transform_4, window_bounds = array<i64: 1, 128>}, {transform_indices = @transform_5, window_bounds = array<i64: 128, 1>}, {transform_indices = @transform_6, window_bounds = array<i64: 1, 128>}, {pipeline_mode = #tpu.pipeline_mode<synchronous>, transform_indices = @transform_7, window_bounds = array<i64: 1, 1>}]} {
    %c0 = arith.constant 0 : index
    %c0_0 = arith.constant 0 : index
    %0 = memref.load %arg2[%c0, %c0_0] : memref<1x1xi32, #tpu.memory_space<smem>>
    %c128_i32 = arith.constant 128 : i32
    %1 = arith.muli %arg1, %c128_i32 : i32
    %2 = tpu.assume_multiple %1, 128 : i32
    %c0_i32 = arith.constant 0 : i32
    %3 = arith.cmpi eq, %arg0, %c0_i32 : i32
    %c0_i32_1 = arith.constant 0 : i32
    %4 = arith.cmpi eq, %arg1, %c0_i32_1 : i32
    %5 = arith.andi %3, %4 : i1
    %6 = arith.extui %5 : i1 to i32
    %c0_i32_2 = arith.constant 0 : i32
    %7 = arith.cmpi ne, %6, %c0_i32_2 : i32
    scf.if %7 {
      %cst_45 = arith.constant 0.000000e+00 : f32
      %c0_46 = arith.constant 0 : index
      %c0_47 = arith.constant 0 : index
      %98 = memref.load %arg16[%c0_46, %c0_47] : memref<1x1xf32, #tpu.memory_space<smem>>
      memref.store %cst_45, %arg16[%c0_46, %c0_47] : memref<1x1xf32, #tpu.memory_space<smem>>
      %cst_48 = arith.constant -1.000000e+30 : f32
      %99 = vector.broadcast %cst_48 : f32 to vector<1x256xf32>
      %c0_49 = arith.constant 0 : index
      %c0_50 = arith.constant 0 : index
      %100 = vector.load %arg13[%c0_49, %c0_50] : memref<1x256xf32, #tpu.memory_space<vmem>>, vector<1x256xf32>
      tpu.vector_store %arg13[%c0_49, %c0_50], %99 {strides = array<i32>} : memref<1x256xf32, #tpu.memory_space<vmem>>, vector<1x256xf32>,
      %cst_51 = arith.constant 0.000000e+00 : f32
      %101 = vector.broadcast %cst_51 : f32 to vector<1x256xf32>
      %c0_52 = arith.constant 0 : index
      %c0_53 = arith.constant 0 : index
      %102 = vector.load %arg14[%c0_52, %c0_53] : memref<1x256xf32, #tpu.memory_space<vmem>>, vector<1x256xf32>
      tpu.vector_store %arg14[%c0_52, %c0_53], %101 {strides = array<i32>} : memref<1x256xf32, #tpu.memory_space<vmem>>, vector<1x256xf32>,
      %cst_54 = arith.constant 0.000000e+00 : f32
      %103 = vector.broadcast %cst_54 : f32 to vector<1x256xf32>
      %c0_55 = arith.constant 0 : index
      %c0_56 = arith.constant 0 : index
      %104 = vector.load %arg15[%c0_55, %c0_56] : memref<1x256xf32, #tpu.memory_space<vmem>>, vector<1x256xf32>
      tpu.vector_store %arg15[%c0_55, %c0_56], %103 {strides = array<i32>} : memref<1x256xf32, #tpu.memory_space<vmem>>, vector<1x256xf32>,
    } else {
    }
    %c0_i32_3 = arith.constant 0 : i32
    %8 = arith.cmpi eq, %arg1, %c0_i32_3 : i32
    %9 = arith.extui %8 : i1 to i32
    %c0_i32_4 = arith.constant 0 : i32
    %10 = arith.cmpi ne, %9, %c0_i32_4 : i32
    scf.if %10 {
      %cst_45 = arith.constant -1.000000e+30 : f32
      %98 = vector.broadcast %cst_45 : f32 to vector<128x1xf32>
      %c0_46 = arith.constant 0 : index
      %c0_47 = arith.constant 0 : index
      %99 = vector.load %arg10[%c0_46, %c0_47] : memref<128x1xf32, #tpu.memory_space<vmem>>, vector<128x1xf32>
      tpu.vector_store %arg10[%c0_46, %c0_47], %98 {strides = array<i32>} : memref<128x1xf32, #tpu.memory_space<vmem>>, vector<128x1xf32>,
      %cst_48 = arith.constant 0.000000e+00 : f32
      %100 = vector.broadcast %cst_48 : f32 to vector<128x1xf32>
      %c0_49 = arith.constant 0 : index
      %c0_50 = arith.constant 0 : index
      %101 = vector.load %arg11[%c0_49, %c0_50] : memref<128x1xf32, #tpu.memory_space<vmem>>, vector<128x1xf32>
      tpu.vector_store %arg11[%c0_49, %c0_50], %100 {strides = array<i32>} : memref<128x1xf32, #tpu.memory_space<vmem>>, vector<128x1xf32>,
      %cst_51 = arith.constant 0.000000e+00 : f32
      %102 = vector.broadcast %cst_51 : f32 to vector<128x1xf32>
      %c0_52 = arith.constant 0 : index
      %c0_53 = arith.constant 0 : index
      %103 = vector.load %arg12[%c0_52, %c0_53] : memref<128x1xf32, #tpu.memory_space<vmem>>, vector<128x1xf32>
      tpu.vector_store %arg12[%c0_52, %c0_53], %102 {strides = array<i32>} : memref<128x1xf32, #tpu.memory_space<vmem>>, vector<128x1xf32>,
    } else {
    }
    %c0_5 = arith.constant 0 : index
    %c0_6 = arith.constant 0 : index
    %11 = vector.load %arg3[%c0_5, %c0_6] : memref<128x128xbf16, #tpu.memory_space<vmem>>, vector<128x128xbf16>
    %12 = arith.index_cast %2 : i32 to index
    %c0_7 = arith.constant 0 : index
    %13 = vector.load %arg4[%12, %c0_7] : memref<256x128xbf16, #tpu.memory_space<vmem>>, vector<128x128xbf16>
    %cst = arith.constant dense<0.000000e+00> : vector<128x128xf32>
    %14 = tpu.matmul %11, %13, %cst {dimension_numbers = #tpu.dot_dimension_numbers<[1], [1], [0], [0], [0, 0, 1, 0], [], []>} : vector<128x128xbf16>, vector<128x128xbf16>, vector<128x128xf32> -> vector<128x128xf32>
    %c128_i32_8 = arith.constant 128 : i32
    %15 = arith.muli %arg0, %c128_i32_8 : i32
    %16 = tpu.iota {dimensions = array<i32: 0>} : vector<128x1xi32>
    %17 = vector.broadcast %15 : i32 to vector<128x1xi32>
    %18 = arith.addi %17, %16 : vector<128x1xi32>
    %19 = tpu.iota {dimensions = array<i32: 1>} : vector<1x128xi32>
    %20 = vector.broadcast %2 : i32 to vector<1x128xi32>
    %21 = arith.addi %20, %19 : vector<1x128xi32>
    %22 = vector.broadcast %0 : i32 to vector<128x1xi32>
    %23 = arith.cmpi slt, %18, %22 : vector<128x1xi32>
    %24 = vector.broadcast %0 : i32 to vector<1x128xi32>
    %25 = arith.cmpi slt, %21, %24 : vector<1x128xi32>
    %26 = vector.broadcast %23 : vector<128x1xi1> to vector<128x128xi1>
    %27 = vector.broadcast %25 : vector<1x128xi1> to vector<128x128xi1>
    %28 = arith.andi %26, %27 : vector<128x128xi1>
    %cst_9 = arith.constant -1.000000e+30 : f32
    %29 = vector.broadcast %cst_9 : f32 to vector<128x128xf32>
    %30 = arith.select %28, %14, %29 : vector<128x128xi1>, vector<128x128xf32>
    %c0_10 = arith.constant 0 : index
    %c0_11 = arith.constant 0 : index
    %31 = vector.load %arg5[%c0_10, %c0_11] : memref<128x1xi32, #tpu.memory_space<vmem>>, vector<128x1xi32>
    %c0_12 = arith.constant 0 : index
    %c0_13 = arith.constant 0 : index
    %32 = vector.load %arg6[%c0_12, %c0_13] : memref<1x128xi32, #tpu.memory_space<vmem>>, vector<1x128xi32>
    %33 = vector.broadcast %31 : vector<128x1xi32> to vector<128x128xi32>
    %34 = vector.broadcast %32 : vector<1x128xi32> to vector<128x128xi32>
    %35 = arith.cmpi eq, %33, %34 : vector<128x128xi32>
    %36 = arith.andi %35, %28 : vector<128x128xi1>
    %cst_14 = arith.constant 0.000000e+00 : f32
    %37 = vector.broadcast %cst_14 : f32 to vector<128x128xf32>
    %38 = arith.select %36, %14, %37 : vector<128x128xi1>, vector<128x128xf32>
    %c0_15 = arith.constant 0 : index
    %c0_16 = arith.constant 0 : index
    %39 = vector.load %arg10[%c0_15, %c0_16] : memref<128x1xf32, #tpu.memory_space<vmem>>, vector<128x1xf32>
    %cst_17 = arith.constant dense<0xFF800000> : vector<128xf32>
    %40 = vector.multi_reduction <maximumf>, %30, %cst_17 [1] : vector<128x128xf32> to vector<128xf32>
    %41 = vector.shape_cast %40 : vector<128xf32> to vector<128x1xf32>
    %42 = arith.maximumf %39, %41 : vector<128x1xf32>
    %43 = arith.subf %39, %42 : vector<128x1xf32>
    %44 = math.exp %43 : vector<128x1xf32>
    %c0_18 = arith.constant 0 : index
    %c0_19 = arith.constant 0 : index
    %45 = vector.load %arg11[%c0_18, %c0_19] : memref<128x1xf32, #tpu.memory_space<vmem>>, vector<128x1xf32>
    %46 = arith.mulf %44, %45 : vector<128x1xf32>
    %47 = vector.broadcast %42 : vector<128x1xf32> to vector<128x128xf32>
    %48 = arith.subf %30, %47 : vector<128x128xf32>
    %49 = math.exp %48 : vector<128x128xf32>
    %cst_20 = arith.constant dense<0.000000e+00> : vector<128xf32>
    %50 = vector.multi_reduction <add>, %49, %cst_20 [1] : vector<128x128xf32> to vector<128xf32>
    %51 = vector.shape_cast %50 : vector<128xf32> to vector<128x1xf32>
    %52 = arith.addf %46, %51 : vector<128x1xf32>
    %c0_21 = arith.constant 0 : index
    %c0_22 = arith.constant 0 : index
    %53 = vector.load %arg11[%c0_21, %c0_22] : memref<128x1xf32, #tpu.memory_space<vmem>>, vector<128x1xf32>
    tpu.vector_store %arg11[%c0_21, %c0_22], %52 {strides = array<i32>} : memref<128x1xf32, #tpu.memory_space<vmem>>, vector<128x1xf32>,
    %c0_23 = arith.constant 0 : index
    %c0_24 = arith.constant 0 : index
    %54 = vector.load %arg10[%c0_23, %c0_24] : memref<128x1xf32, #tpu.memory_space<vmem>>, vector<128x1xf32>
    tpu.vector_store %arg10[%c0_23, %c0_24], %42 {strides = array<i32>} : memref<128x1xf32, #tpu.memory_space<vmem>>, vector<128x1xf32>,
    %c0_25 = arith.constant 0 : index
    %c0_26 = arith.constant 0 : index
    %55 = vector.load %arg12[%c0_25, %c0_26] : memref<128x1xf32, #tpu.memory_space<vmem>>, vector<128x1xf32>
    %cst_27 = arith.constant dense<0.000000e+00> : vector<128xf32>
    %56 = vector.multi_reduction <add>, %38, %cst_27 [1] : vector<128x128xf32> to vector<128xf32>
    %57 = vector.shape_cast %56 : vector<128xf32> to vector<128x1xf32>
    %58 = arith.addf %55, %57 : vector<128x1xf32>
    %c0_28 = arith.constant 0 : index
    %c0_29 = arith.constant 0 : index
    %59 = vector.load %arg12[%c0_28, %c0_29] : memref<128x1xf32, #tpu.memory_space<vmem>>, vector<128x1xf32>
    tpu.vector_store %arg12[%c0_28, %c0_29], %58 {strides = array<i32>} : memref<128x1xf32, #tpu.memory_space<vmem>>, vector<128x1xf32>,
    %c0_30 = arith.constant 0 : index
    %60 = arith.index_cast %2 : i32 to index
    %61 = vector.load %arg13[%c0_30, %60] : memref<1x256xf32, #tpu.memory_space<vmem>>, vector<1x128xf32>
    %cst_31 = arith.constant dense<0xFF800000> : vector<128xf32>
    %62 = vector.multi_reduction <maximumf>, %30, %cst_31 [0] : vector<128x128xf32> to vector<128xf32>
    %63 = vector.shape_cast %62 : vector<128xf32> to vector<1x128xf32>
    %64 = arith.maximumf %61, %63 : vector<1x128xf32>
    %65 = arith.subf %61, %64 : vector<1x128xf32>
    %66 = math.exp %65 : vector<1x128xf32>
    %c0_32 = arith.constant 0 : index
    %67 = arith.index_cast %2 : i32 to index
    %68 = vector.load %arg14[%c0_32, %67] : memref<1x256xf32, #tpu.memory_space<vmem>>, vector<1x128xf32>
    %69 = arith.mulf %66, %68 : vector<1x128xf32>
    %70 = vector.broadcast %64 : vector<1x128xf32> to vector<128x128xf32>
    %71 = arith.subf %30, %70 : vector<128x128xf32>
    %72 = math.exp %71 : vector<128x128xf32>
    %cst_33 = arith.constant dense<0.000000e+00> : vector<128xf32>
    %73 = vector.multi_reduction <add>, %72, %cst_33 [0] : vector<128x128xf32> to vector<128xf32>
    %74 = vector.shape_cast %73 : vector<128xf32> to vector<1x128xf32>
    %75 = arith.addf %69, %74 : vector<1x128xf32>
    %c0_34 = arith.constant 0 : index
    %76 = arith.index_cast %2 : i32 to index
    %77 = vector.load %arg14[%c0_34, %76] : memref<1x256xf32, #tpu.memory_space<vmem>>, vector<1x128xf32>
    tpu.vector_store %arg14[%c0_34, %76], %75 {strides = array<i32>} : memref<1x256xf32, #tpu.memory_space<vmem>>, vector<1x128xf32>,
    %c0_35 = arith.constant 0 : index
    %78 = arith.index_cast %2 : i32 to index
    %79 = vector.load %arg13[%c0_35, %78] : memref<1x256xf32, #tpu.memory_space<vmem>>, vector<1x128xf32>
    tpu.vector_store %arg13[%c0_35, %78], %64 {strides = array<i32>} : memref<1x256xf32, #tpu.memory_space<vmem>>, vector<1x128xf32>,
    %c0_36 = arith.constant 0 : index
    %80 = arith.index_cast %2 : i32 to index
    %81 = vector.load %arg15[%c0_36, %80] : memref<1x256xf32, #tpu.memory_space<vmem>>, vector<1x128xf32>
    %cst_37 = arith.constant dense<0.000000e+00> : vector<128xf32>
    %82 = vector.multi_reduction <add>, %38, %cst_37 [0] : vector<128x128xf32> to vector<128xf32>
    %83 = vector.shape_cast %82 : vector<128xf32> to vector<1x128xf32>
    %84 = arith.addf %81, %83 : vector<1x128xf32>
    %c0_38 = arith.constant 0 : index
    %85 = arith.index_cast %2 : i32 to index
    %86 = vector.load %arg15[%c0_38, %85] : memref<1x256xf32, #tpu.memory_space<vmem>>, vector<1x128xf32>
    tpu.vector_store %arg15[%c0_38, %85], %84 {strides = array<i32>} : memref<1x256xf32, #tpu.memory_space<vmem>>, vector<1x128xf32>,
    %c1_i32 = arith.constant 1 : i32
    %87 = arith.cmpi eq, %arg1, %c1_i32 : i32
    %88 = arith.extui %87 : i1 to i32
    %c0_i32_39 = arith.constant 0 : i32
    %89 = arith.cmpi ne, %88, %c0_i32_39 : i32
    scf.if %89 {
      %c0_45 = arith.constant 0 : index
      %c0_46 = arith.constant 0 : index
      %98 = vector.load %arg10[%c0_45, %c0_46] : memref<128x1xf32, #tpu.memory_space<vmem>>, vector<128x1xf32>
      %c0_47 = arith.constant 0 : index
      %c0_48 = arith.constant 0 : index
      %99 = vector.load %arg11[%c0_47, %c0_48] : memref<128x1xf32, #tpu.memory_space<vmem>>, vector<128x1xf32>
      %100 = math.log %99 : vector<128x1xf32>
      %101 = arith.addf %98, %100 : vector<128x1xf32>
      %c0_49 = arith.constant 0 : index
      %c0_50 = arith.constant 0 : index
      %102 = vector.load %arg12[%c0_49, %c0_50] : memref<128x1xf32, #tpu.memory_space<vmem>>, vector<128x1xf32>
      %c0_51 = arith.constant 0 : index
      %c0_52 = arith.constant 0 : index
      %103 = vector.load %arg7[%c0_51, %c0_52] : memref<128x1xf32, #tpu.memory_space<vmem>>, vector<128x1xf32>
      %104 = arith.mulf %102, %103 : vector<128x1xf32>
      %105 = arith.subf %101, %104 : vector<128x1xf32>
      %c0_53 = arith.constant 0 : index
      %c0_54 = arith.constant 0 : index
      %106 = memref.load %arg16[%c0_53, %c0_54] : memref<1x1xf32, #tpu.memory_space<smem>>
      %cst_55 = arith.constant 0.000000e+00 : f32
      %107 = vector.broadcast %cst_55 : f32 to vector<128x1xf32>
      %108 = arith.select %23, %105, %107 : vector<128x1xi1>, vector<128x1xf32>
      %109 = vector.shape_cast %108 : vector<128x1xf32> to vector<1x128x1xf32>
      %cst_56 = arith.constant dense<0.000000e+00> : vector<1xf32>
      %110 = vector.multi_reduction <add>, %109, %cst_56 [1, 2] : vector<1x128x1xf32> to vector<1xf32>
      %111 = vector.shape_cast %110 : vector<1xf32> to vector<1x1x1xf32>
      %112 = vector.extract %111[0, 0, 0] : f32 from vector<1x1x1xf32>
      %113 = arith.addf %106, %112 : f32
      %c0_57 = arith.constant 0 : index
      %c0_58 = arith.constant 0 : index
      %114 = memref.load %arg16[%c0_57, %c0_58] : memref<1x1xf32, #tpu.memory_space<smem>>
      memref.store %113, %arg16[%c0_57, %c0_58] : memref<1x1xf32, #tpu.memory_space<smem>>
    } else {
    }
    %c1_i32_40 = arith.constant 1 : i32
    %90 = arith.cmpi eq, %arg0, %c1_i32_40 : i32
    %91 = arith.extui %90 : i1 to i32
    %c0_i32_41 = arith.constant 0 : i32
    %92 = arith.cmpi ne, %91, %c0_i32_41 : i32
    scf.if %92 {
      %c0_45 = arith.constant 0 : index
      %98 = arith.index_cast %2 : i32 to index
      %99 = vector.load %arg13[%c0_45, %98] : memref<1x256xf32, #tpu.memory_space<vmem>>, vector<1x128xf32>
      %c0_46 = arith.constant 0 : index
      %100 = arith.index_cast %2 : i32 to index
      %101 = vector.load %arg14[%c0_46, %100] : memref<1x256xf32, #tpu.memory_space<vmem>>, vector<1x128xf32>
      %102 = math.log %101 : vector<1x128xf32>
      %103 = arith.addf %99, %102 : vector<1x128xf32>
      %c0_47 = arith.constant 0 : index
      %104 = arith.index_cast %2 : i32 to index
      %105 = vector.load %arg15[%c0_47, %104] : memref<1x256xf32, #tpu.memory_space<vmem>>, vector<1x128xf32>
      %c0_48 = arith.constant 0 : index
      %c0_49 = arith.constant 0 : index
      %106 = vector.load %arg8[%c0_48, %c0_49] : memref<1x128xf32, #tpu.memory_space<vmem>>, vector<1x128xf32>
      %107 = arith.mulf %105, %106 : vector<1x128xf32>
      %108 = arith.subf %103, %107 : vector<1x128xf32>
      %c0_50 = arith.constant 0 : index
      %c0_51 = arith.constant 0 : index
      %109 = memref.load %arg16[%c0_50, %c0_51] : memref<1x1xf32, #tpu.memory_space<smem>>
      %cst_52 = arith.constant 0.000000e+00 : f32
      %110 = vector.broadcast %cst_52 : f32 to vector<1x128xf32>
      %111 = arith.select %25, %108, %110 : vector<1x128xi1>, vector<1x128xf32>
      %112 = vector.shape_cast %111 : vector<1x128xf32> to vector<1x1x128xf32>
      %cst_53 = arith.constant dense<0.000000e+00> : vector<1xf32>
      %113 = vector.multi_reduction <add>, %112, %cst_53 [1, 2] : vector<1x1x128xf32> to vector<1xf32>
      %114 = vector.shape_cast %113 : vector<1xf32> to vector<1x1x1xf32>
      %115 = vector.extract %114[0, 0, 0] : f32 from vector<1x1x1xf32>
      %116 = arith.addf %109, %115 : f32
      %c0_54 = arith.constant 0 : index
      %c0_55 = arith.constant 0 : index
      %117 = memref.load %arg16[%c0_54, %c0_55] : memref<1x1xf32, #tpu.memory_space<smem>>
      memref.store %116, %arg16[%c0_54, %c0_55] : memref<1x1xf32, #tpu.memory_space<smem>>
    } else {
    }
    %c1_i32_42 = arith.constant 1 : i32
    %93 = arith.cmpi eq, %arg0, %c1_i32_42 : i32
    %c1_i32_43 = arith.constant 1 : i32
    %94 = arith.cmpi eq, %arg1, %c1_i32_43 : i32
    %95 = arith.andi %93, %94 : i1
    %96 = arith.extui %95 : i1 to i32
    %c0_i32_44 = arith.constant 0 : i32
    %97 = arith.cmpi ne, %96, %c0_i32_44 : i32
    scf.if %97 {
      %c0_45 = arith.constant 0 : index
      %c0_46 = arith.constant 0 : index
      %98 = memref.load %arg16[%c0_45, %c0_46] : memref<1x1xf32, #tpu.memory_space<smem>>
      %cst_47 = arith.constant 5.000000e-01 : f32
      %99 = arith.mulf %cst_47, %98 : f32
      %100 = arith.sitofp %0 : i32 to f32
      %101 = arith.divf %99, %100 : f32
      %102 = vector.broadcast %101 : f32 to vector<1x1xf32>
      %c0_48 = arith.constant 0 : index
      %c0_49 = arith.constant 0 : index
      %103 = vector.load %arg9[%c0_48, %c0_49] : memref<1x1xf32, #tpu.memory_space<vmem>>, vector<1x1xf32>
      tpu.vector_store %arg9[%c0_48, %c0_49], %102 {strides = array<i32>} : memref<1x1xf32, #tpu.memory_space<vmem>>, vector<1x1xf32>,
    } else {
    }
    return
  }
  func.func @transform_0(%arg0: i32, %arg1: i32) -> (i32, i32) {
    %c0_i32 = arith.constant 0 : i32
    %c0_i32_0 = arith.constant 0 : i32
    %c0_i32_1 = arith.constant 0 : i32
    return %c0_i32, %c0_i32_0 : i32, i32
  }
  func.func @transform_1(%arg0: i32, %arg1: i32) -> (i32, i32) {
    %c0_i32 = arith.constant 0 : i32
    %c0_i32_0 = arith.constant 0 : i32
    return %arg0, %c0_i32 : i32, i32
  }
  func.func @transform_2(%arg0: i32, %arg1: i32) -> (i32, i32) {
    %c0_i32 = arith.constant 0 : i32
    %c0_i32_0 = arith.constant 0 : i32
    %c0_i32_1 = arith.constant 0 : i32
    return %c0_i32, %c0_i32_0 : i32, i32
  }
  func.func @transform_3(%arg0: i32, %arg1: i32) -> (i32, i32) {
    %c0_i32 = arith.constant 0 : i32
    %c0_i32_0 = arith.constant 0 : i32
    return %arg0, %c0_i32 : i32, i32
  }
  func.func @transform_4(%arg0: i32, %arg1: i32) -> (i32, i32) {
    %c0_i32 = arith.constant 0 : i32
    %c0_i32_0 = arith.constant 0 : i32
    return %c0_i32, %arg1 : i32, i32
  }
  func.func @transform_5(%arg0: i32, %arg1: i32) -> (i32, i32) {
    %c0_i32 = arith.constant 0 : i32
    %c0_i32_0 = arith.constant 0 : i32
    return %arg0, %c0_i32 : i32, i32
  }
  func.func @transform_6(%arg0: i32, %arg1: i32) -> (i32, i32) {
    %c0_i32 = arith.constant 0 : i32
    %c0_i32_0 = arith.constant 0 : i32
    return %c0_i32, %arg1 : i32, i32
  }
  func.func @transform_7(%arg0: i32, %arg1: i32) -> (i32, i32) {
    %c0_i32 = arith.constant 0 : i32
    %c0_i32_0 = arith.constant 0 : i32
    %c0_i32_1 = arith.constant 0 : i32
    return %c0_i32, %c0_i32_0 : i32, i32
  }
}

</mosaic_0001>

<bundles_post_ra>
// kernel: tpu_custom_call.1
= control target key start
LH: loop header
LB: loop body
LE: loop exit
PB: predicated region body
PF: predicated region fallthrough
CT: control target
= control target key end

     0   :  { %s3445_s0 = inlined_call_operand.<no memory space> [shape: s32[1,1], index: 0, kind: input, shape index: {}]   ;;  %s3446_s1 = inlined_call_operand.vmem [shape: bf16[256,128], index: 1, kind: input, shape index: {}]   ;;  %s3447_s2 = inlined_call_operand.vmem [shape: bf16[256,128], index: 2, kind: input, shape index: {}]   ;;  %s3448_s3 = inlined_call_operand.vmem [shape: s32[256,1], index: 3, kind: input, shape index: {}]   ;;  %s3449_s4 = inlined_call_operand.vmem [shape: s32[1,256], index: 4, kind: input, shape index: {}]   ;;  %s3450_s5 = inlined_call_operand.vmem [shape: f32[256,1], index: 5, kind: input, shape index: {}]   ;;  %s3451_s6 = inlined_call_operand.vmem [shape: f32[1,256], index: 6, kind: input, shape index: {}]   ;;  %s3452_s7 = inlined_call_operand.hbm [shape: f32[1,1], index: 7, kind: output, shape index: {}]  }
   0x1   :  { %12 = sst [smem:[#allocation9]] %s3445_s0 }
   0x2   :  { %13 = vsyncpa [#allocation11], 0  ;;  %s2249_s26 = smov 0   ;;  %s2251_s27 = smov 0  }
   0x3   :  { %s2253_s28 = smov 0   ;;  %s2255_s29 = smov 0  }
   0x4   :  { %s2257_s30 = smov 0  }
   0x5 LB: > { %s28_s8 = sadd.s32 1, %s2189_s28  ;;  %s31_s9 = sadd.s32 1, %s2193_s29  ;;  %s2197_s30 = sphi %s2257_s30, %s19_s30   ;;  %s2193_s29 = sphi %s2255_s29, %s3647_s29   ;;  %s2189_s28 = sphi %s2253_s28, %s3646_s28   ;;  %s2185_s27 = sphi %s2251_s27, %s3645_s27   ;;  %s2181_s26 = sphi %s2249_s26, %s3644_s26  }
   0x6   : > { %p29_p0 = scmp.ge.s32.totalorder %s28_s8, 2  ;;  %p1822_p1 = scmp.ge.s32.totalorder %s2197_s30, 1 }
   0x7   : > { %p285_p2 = scmp.lt.s32.totalorder %s2197_s30, 5 }
   0x8   : > { %s3649_s8 = smov (%p29_p0, %s28_s8), 0  ;;  %s3651_s9 = smov (!%p29_p0, %s31_s9), %s2193_s29 }
   0x9   : > { %3493 = sst [smem:[#allocation13_spill]] %s3649_s8  ;;  %p286_p3 = pnand %p1822_p1, %p285_p2 }
   0xa   : > { %p33_p4 = scmp.ge.s32.totalorder %s3651_s9, 2 }
   0xb   : > { %289 = sbr.rel (%p286_p3) target bundleno = 1436 (0x59c), region = 48 }
   0xc   : > { %s3653_s9 = smov (%p33_p4, %s3651_s9), 0 }
   0xd   : > { %3494 = sst [smem:[#allocation14_spill]] %s3653_s9 }
  0x10   : > { %s1823_s10 = sshll.u32 %s2185_s27, 4  ;;  %p340_p5 = scmp.lt.s32.totalorder %s2181_s26, 1 }
  0x11   : > { %p329_p6 = scmp.lt.s32.totalorder %s1823_s10, 31  ;;  %s2286_s11 = sld [smem:[#allocation9]] }
  0x12   : > { %s2289_s12 = scalar_select %p340_p5, %s2181_s26, 1 }
  0x13   : > { %s3655_s10 = smov (!%p329_p6, %s1823_s10), 31  ;;  %s2315_s14 = sshll.u32 %s2181_s26, 7 }
  0x14   : > { %s342_s15 = scalar_lea.vmem %s3449_s4, %s2289_s12  ;;  %s351_s18 = scalar_lea.vmem %s3451_s6, %s2289_s12 }
  0x15   : > { %s1824_s19 = sshll.u32 %s3655_s10, 2  ;;  %s1826_s20 = sshll.u32 %s3655_s10, 3 }
  0x16   : > { %s2302_s23 = scalar_lea.vmem %s3446_s1, %s1824_s19  ;;  %s2307_s0 = scalar_lea.vmem %s3448_s3, %s1826_s20 }
  0x17   : > { %s2312_s13 = scalar_lea.vmem %s3450_s5, %s1826_s20  ;;  %p355_p7 = scmp.eq.s32.totalorder %s2185_s27, 0 }
  0x18   : > { %p356_p8 = scmp.eq.s32.totalorder %s2181_s26, 0 }
  0x1a   : > { %p357_p9 = pnand %p356_p8, %p355_p7 }
  0x1b   : > { %s2199_s10 = smov (!%p357_p9), 0.0  }
  0x1c   : > { %360 = sbr.rel (%p357_p9) target bundleno = 38 (0x26), region = 52  ;;  %362 = sst [smem:[#allocation8]] (!%p357_p9), %s2199_s10 }
  0x21   : > { %v363_v0 = vlaneseq  ;;  %v2200_v1 = vmov -1e+30   ;;  %v2201_v2 = vmov 0.0  }
  0x23   : > { %vm365_vm0 = vcmp.lt.s32.totalorder %v363_v0, 256 }
  0x24   : > { %367 = vst.msk [vmem:[#allocation5] sm:$0x3] %vm365_vm0, %v2200_v1  ;;  %368 = vst.msk [vmem:[#allocation6] sm:$0x3] %vm365_vm0, %v2201_v2 }
  0x25   : > { %369 = vst.msk [vmem:[#allocation7] sm:$0x3] %vm365_vm0, %v2201_v2 }
  0x26 PF: > { %p1830_p10 = scmp.ne.s32.totalorder %s2181_s26, 0 }
  0x28   : > { %372 = sbr.rel (%p1830_p10) target bundleno = 70 (0x46), region = 56 }
  0x2d   : > { %vm373_vm1 = vcmask 7168   ;;  %v2202_v3 = vmov -1e+30   ;;  %v2203_v4 = vmov 0.0  }
  0x2e   : > { %374 = vst.msk [vmem:[#allocation2] sm:$0xff] %vm373_vm1, %v2202_v3  ;;  %375 = vst.msk [vmem:[#allocation2 + $0x8] sm:$0xff] %vm373_vm1, %v2202_v3 }
  0x2f   : > { %376 = vst.msk [vmem:[#allocation2 + $0x10] sm:$0xff] %vm373_vm1, %v2202_v3  ;;  %377 = vst.msk [vmem:[#allocation2 + $0x18] sm:$0xff] %vm373_vm1, %v2202_v3 }
  0x30   : > { %378 = vst.msk [vmem:[#allocation2 + $0x20] sm:$0xff] %vm373_vm1, %v2202_v3  ;;  %379 = vst.msk [vmem:[#allocation2 + $0x28] sm:$0xff] %vm373_vm1, %v2202_v3 }
  0x31   : > { %380 = vst.msk [vmem:[#allocation2 + $0x30] sm:$0xff] %vm373_vm1, %v2202_v3  ;;  %381 = vst.msk [vmem:[#allocation2 + $0x38] sm:$0xff] %vm373_vm1, %v2202_v3 }
  0x32   : > { %382 = vst.msk [vmem:[#allocation2 + $0x40] sm:$0xff] %vm373_vm1, %v2202_v3  ;;  %383 = vst.msk [vmem:[#allocation2 + $0x48] sm:$0xff] %vm373_vm1, %v2202_v3 }
  0x33   : > { %384 = vst.msk [vmem:[#allocation2 + $0x50] sm:$0xff] %vm373_vm1, %v2202_v3  ;;  %385 = vst.msk [vmem:[#allocation2 + $0x58] sm:$0xff] %vm373_vm1, %v2202_v3 }
  0x34   : > { %386 = vst.msk [vmem:[#allocation2 + $0x60] sm:$0xff] %vm373_vm1, %v2202_v3  ;;  %387 = vst.msk [vmem:[#allocation2 + $0x68] sm:$0xff] %vm373_vm1, %v2202_v3 }
  0x35   : > { %388 = vst.msk [vmem:[#allocation2 + $0x70] sm:$0xff] %vm373_vm1, %v2202_v3  ;;  %389 = vst.msk [vmem:[#allocation2 + $0x78] sm:$0xff] %vm373_vm1, %v2202_v3 }
  0x36   : > { %390 = vst.msk [vmem:[#allocation3] sm:$0xff] %vm373_vm1, %v2203_v4  ;;  %391 = vst.msk [vmem:[#allocation3 + $0x8] sm:$0xff] %vm373_vm1, %v2203_v4 }
  0x37   : > { %392 = vst.msk [vmem:[#allocation3 + $0x10] sm:$0xff] %vm373_vm1, %v2203_v4  ;;  %393 = vst.msk [vmem:[#allocation3 + $0x18] sm:$0xff] %vm373_vm1, %v2203_v4 }
  0x38   : > { %394 = vst.msk [vmem:[#allocation3 + $0x20] sm:$0xff] %vm373_vm1, %v2203_v4  ;;  %395 = vst.msk [vmem:[#allocation3 + $0x28] sm:$0xff] %vm373_vm1, %v2203_v4 }
  0x39   : > { %396 = vst.msk [vmem:[#allocation3 + $0x30] sm:$0xff] %vm373_vm1, %v2203_v4  ;;  %397 = vst.msk [vmem:[#allocation3 + $0x38] sm:$0xff] %vm373_vm1, %v2203_v4 }
  0x3a   : > { %398 = vst.msk [vmem:[#allocation3 + $0x40] sm:$0xff] %vm373_vm1, %v2203_v4  ;;  %399 = vst.msk [vmem:[#allocation3 + $0x48] sm:$0xff] %vm373_vm1, %v2203_v4 }
  0x3b   : > { %400 = vst.msk [vmem:[#allocation3 + $0x50] sm:$0xff] %vm373_vm1, %v2203_v4  ;;  %401 = vst.msk [vmem:[#allocation3 + $0x58] sm:$0xff] %vm373_vm1, %v2203_v4 }
  0x3c   : > { %402 = vst.msk [vmem:[#allocation3 + $0x60] sm:$0xff] %vm373_vm1, %v2203_v4  ;;  %403 = vst.msk [vmem:[#allocation3 + $0x68] sm:$0xff] %vm373_vm1, %v2203_v4 }
  0x3d   : > { %404 = vst.msk [vmem:[#allocation3 + $0x70] sm:$0xff] %vm373_vm1, %v2203_v4  ;;  %405 = vst.msk [vmem:[#allocation3 + $0x78] sm:$0xff] %vm373_vm1, %v2203_v4 }
  0x3e   : > { %406 = vst.msk [vmem:[#allocation4] sm:$0xff] %vm373_vm1, %v2203_v4  ;;  %407 = vst.msk [vmem:[#allocation4 + $0x8] sm:$0xff] %vm373_vm1, %v2203_v4 }
  0x3f   : > { %408 = vst.msk [vmem:[#allocation4 + $0x10] sm:$0xff] %vm373_vm1, %v2203_v4  ;;  %409 = vst.msk [vmem:[#allocation4 + $0x18] sm:$0xff] %vm373_vm1, %v2203_v4 }
  0x40   : > { %410 = vst.msk [vmem:[#allocation4 + $0x20] sm:$0xff] %vm373_vm1, %v2203_v4  ;;  %411 = vst.msk [vmem:[#allocation4 + $0x28] sm:$0xff] %vm373_vm1, %v2203_v4 }
  0x41   : > { %412 = vst.msk [vmem:[#allocation4 + $0x30] sm:$0xff] %vm373_vm1, %v2203_v4  ;;  %413 = vst.msk [vmem:[#allocation4 + $0x38] sm:$0xff] %vm373_vm1, %v2203_v4 }
  0x42   : > { %414 = vst.msk [vmem:[#allocation4 + $0x40] sm:$0xff] %vm373_vm1, %v2203_v4  ;;  %415 = vst.msk [vmem:[#allocation4 + $0x48] sm:$0xff] %vm373_vm1, %v2203_v4 }
  0x43   : > { %416 = vst.msk [vmem:[#allocation4 + $0x50] sm:$0xff] %vm373_vm1, %v2203_v4  ;;  %417 = vst.msk [vmem:[#allocation4 + $0x58] sm:$0xff] %vm373_vm1, %v2203_v4 }
  0x44   : > { %418 = vst.msk [vmem:[#allocation4 + $0x60] sm:$0xff] %vm373_vm1, %v2203_v4  ;;  %419 = vst.msk [vmem:[#allocation4 + $0x68] sm:$0xff] %vm373_vm1, %v2203_v4 }
  0x45   : > { %420 = vst.msk [vmem:[#allocation4 + $0x70] sm:$0xff] %vm373_vm1, %v2203_v4  ;;  %421 = vst.msk [vmem:[#allocation4 + $0x78] sm:$0xff] %vm373_vm1, %v2203_v4 }
  0x46 PF: > { %s438_s8 = sshra.s32 %s2315_s14, 3  ;;  %v1989_v5 = vld [vmem:[%s2302_s23] sm:$0xff]   ;;  %v2204_v8 = vmov 0   ;;  %v776_v11 = vld [vmem:[%s2307_s0 + $0x10] sm:$0xff]  ;;  %v777_v13 = vld [vmem:[%s2307_s0 + $0x18] sm:$0xff]  ;;  %v3463_v35 = vlaneseq  ;;  %s1848_s20 = sshll.u32 %s2185_s27, 7  ;;  %v688_v43 = vstv %s2315_s14 }
  0x47   : > { %s1831_s9 = sshll.u32 %s438_s8, 2  ;;  %v1990_v6 = vld [vmem:[%s2302_s23 + $0x20] sm:$0xff]   ;;  %1888 = vmatprep.mubr.bf16.mxu0 %v1989_v5  ;;  %1980 = vset.pattern.permute.xlu1 %v2204_v8  ;;  %v775_v14 = vld [vmem:[%s2307_s0 + $0x8] sm:$0xff]  ;;  %v781_v18 = vld [vmem:[%s2307_s0 + $0x38] sm:$0xff]  ;;  %v2414_v42 = vstv %s1848_s20  ;;  %v3500_v58 = vmov 0  ;;  %v3509_v4 = vmov 0 }
  0x48   : > { %s2374_s19 = scalar_lea.vmem %s3447_s2, %s1831_s9  ;;  %1896 = vmatprep.mubr.bf16.mxu1 %v1990_v6  ;;  %1979 = vset.pattern.permute.xlu0 %v2204_v8  ;;  %v774_v12 = vld [vmem:[%s2307_s0] sm:$0xff]  ;;  %v779_v16 = vld [vmem:[%s2307_s0 + $0x28] sm:$0xff]  ;;  %v780_v19 = vld [vmem:[%s2307_s0 + $0x30] sm:$0xff]  ;;  %v2405_v37 = vshrl.u32 %v3463_v35, 7  ;;  %v687_v40 = vand.u32 127, %v3463_v35  ;;  %v2426_v50 = vstv %s2286_s11  ;;  %p1463_p11 = scmp.eq.s32.totalorder %s2181_s26, 1 }
  0x49   : > { %v1981_v7 = vld [vmem:[%s2374_s19 + $0x38] sm:$0xff]   ;;  %v1982_v9 = vld [vmem:[%s2374_s19 + $0x30] sm:$0xff]   ;;  %v1983_v10 = vld [vmem:[%s2374_s19 + $0x28] sm:$0xff]   ;;  %798 = vperm.xlu1 %1980, %v776_v11   ;;  %792 = vperm.xlu0 %1979, %v774_v12   ;;  %3496 = vst [vmem:[#allocation16_spill] sm:$0xff] %v2426_v50  ;;  %p1850_p12 = scmp.ne.s32.totalorder %s2181_s26, 1 }
  0x4a   : > { %1872 = vmatprep.subr.bf16.mxu0 %v1981_v7  ;;  %1904 = vmatprep.subr.bf16.mxu1 %v1981_v7  ;;  %v1984_v15 = vld [vmem:[%s2374_s19 + $0x20] sm:$0xff]   ;;  %v1985_v20 = vld [vmem:[%s2374_s19 + $0x18] sm:$0xff]   ;;  %v783_v21 = vld [vmem:[%s2307_s0 + $0x48] sm:$0xff]  ;;  %v655_v39 = vadd.s32 16, %v2405_v37  ;;  %v663_v44 = vadd.s32 80, %v2405_v37  ;;  %v656_v45 = vadd.s32 24, %v2405_v37  ;;  %v689_v48 = vadd.s32 %v688_v43, %v687_v40 }
  0x4b   : > { %1873 = vmatpush3.bf16.xpose.msra.mxu0 %v1981_v7  ;;  %1912 = vmatpush3.bf16.xpose.msra.mxu1 %v1981_v7  ;;  %v778_v17 = vld [vmem:[%s2307_s0 + $0x20] sm:$0xff]  ;;  %v785_v23 = vld [vmem:[%s2307_s0 + $0x58] sm:$0xff]  ;;  %v784_v24 = vld [vmem:[%s2307_s0 + $0x50] sm:$0xff]  ;;  %v661_v49 = vadd.s32 64, %v2405_v37  ;;  %v654_v52 = vadd.s32 8, %v2405_v37  ;;  %v2434_v53 = vadd.s32 %v2414_v42, %v2405_v37  ;;  %v659_v54 = vadd.s32 48, %v2405_v37 }
  0x4c   : > { %1874 = vmatprep.subr.bf16.mxu0 %v1982_v9  ;;  %1905 = vmatprep.subr.bf16.mxu1 %v1982_v9  ;;  %v782_v22 = vld [vmem:[%s2307_s0 + $0x40] sm:$0xff]  ;;  %v1986_v25 = vld [vmem:[%s2374_s19 + $0x10] sm:$0xff]   ;;  %v1987_v26 = vld [vmem:[%s2374_s19 + $0x8] sm:$0xff]   ;;  %v2422_v47 = vadd.s32 %v2414_v42, %v655_v39  ;;  %v2429_v51 = vadd.s32 %v2414_v42, %v663_v44  ;;  %v662_v55 = vadd.s32 72, %v2405_v37  ;;  %v2441_v57 = vadd.s32 %v2414_v42, %v656_v45  ;;  %s1611_s25 = sld [smem:[#allocation8]] (!%p1850_p12) }
  0x4d   : > { %801 = vperm.xlu1 %1980, %v777_v13   ;;  %795 = vperm.xlu0 %1979, %v775_v14   ;;  %v1988_v27 = vld [vmem:[%s2374_s19] sm:$0xff]   ;;  %v1991_v28 = vld [vmem:[%s2302_s23 + $0x8] sm:$0xff]   ;;  %v1993_v30 = vld [vmem:[%s2302_s23 + $0x10] sm:$0xff]   ;;  %3498 = vst [vmem:[#allocation18_spill] sm:$0xff] %v2434_v53  ;;  %vm2446_vm3 = vcmp.lt.s32.totalorder %v689_v48, %v2426_v50  ;;  %v2451_v59 = vadd.s32 %v2414_v42, %v661_v49  ;;  %v657_v0 = vadd.s32 32, %v2405_v37  ;;  %v664_v2 = vadd.s32 88, %v2405_v37 }
  0x4e   : > { %v1992_v29 = vld [vmem:[%s2302_s23 + $0x28] sm:$0xff]   ;;  %v1995_v31 = vld [vmem:[%s2302_s23 + $0x30] sm:$0xff]   ;;  %v1994_v32 = vld [vmem:[%s2302_s23 + $0x18] sm:$0xff]   ;;  %3495 = vst [vmem:[#allocation15_spill] sm:$0xff] %v2422_v47  ;;  %vm3456_vm2 = vcmp.lt.s32.totalorder %v2422_v47, %v2426_v50  ;;  %v3501_v58 = vsel %vm2446_vm3, 4294967295, %v3500_v58  ;;  %vm3453_vm4 = vcmp.lt.s32.totalorder %v2429_v51, %v2426_v50  ;;  %v2456_v60 = vadd.s32 %v2414_v42, %v654_v52 }
  0x4f   : > { %v1996_v33 = vld [vmem:[%s2302_s23 + $0x38] sm:$0xff]   ;;  %3497 = vst [vmem:[#allocation17_spill] sm:$0xff] %v2429_v51  ;;  %3499 = vst [vmem:[#allocation19_spill] sm:$0xff] %v2441_v57  ;;  %vm3460_vm5 = vcmp.lt.s32.totalorder %v2434_v53, %v2426_v50  ;;  %v2463_v62 = vadd.s32 %v2414_v42, %v659_v54  ;;  %v2466_v63 = vadd.s32 %v2414_v42, %v662_v55  ;;  %v2486_v3 = vld [vmem:[%s342_s15] ss:$0 sm:$0xff]  ;;  %v667_v14 = vadd.s32 112, %v2405_v37 }
  0x50   : > { %3502 = vst [vmem:[#allocation20_spill] sm:$0xff] %v3501_v58  ;;  %3503 = vst [vmem:[#allocation21_spill] sm:$0xff] %v2451_v59  ;;  %vm3455_vm7 = vcmp.lt.s32.totalorder %v2441_v57, %v2426_v50  ;;  %vm3454_vm9 = vcmp.lt.s32.totalorder %v2451_v59, %v2426_v50  ;;  %vm3457_vm11 = vcmp.lt.s32.totalorder %v2456_v60, %v2426_v50  ;;  %v666_v39 = vadd.s32 104, %v2405_v37  ;;  %s2936_s15 = sshra.s32 %s2315_s14, 7 }
  0x51   : > { %807 = vperm.xlu1 %1980, %v779_v16   ;;  %804 = vperm.xlu0 %1979, %v778_v17   ;;  %3504 = vst [vmem:[#allocation22_spill] sm:$0xff] %v2456_v60  ;;  %3505 = vst [vmem:[#allocation23_spill] sm:$0xff] %v2463_v62  ;;  %vm3458_vm13 = vcmp.lt.s32.totalorder %v2463_v62, %v2426_v50  ;;  %vm3459_vm14 = vcmp.lt.s32.totalorder %v2466_v63, %v2426_v50  ;;  %s2939_s23 = scalar_lea.vmem [#allocation5], %s2936_s15  ;;  %s3001_s24 = scalar_lea.vmem [#allocation6], %s2936_s15 }
  0x52   : > { %3506 = vst [vmem:[#allocation24_spill] sm:$0xff] %v2466_v63  ;;  %vm2474_vm6 = vmand %vm3456_vm2, %vm2446_vm3  ;;  %v2526_v8 = vadd.s32 %v2414_v42, %v657_v0  ;;  %v2540_v11 = vadd.s32 %v2414_v42, %v664_v2 }
  0x53   : > { %1875 = vmatpush3.bf16.xpose.msra.mxu0 %v1982_v9  ;;  %1913 = vmatpush3.bf16.xpose.msra.mxu1 %v1982_v9  ;;  %vm2493_vm8 = vmand %vm3453_vm4, %vm2446_vm3  ;;  %v660_v9 = vadd.s32 56, %v2405_v37 }
  0x54   : > { %1876 = vmatprep.subr.bf16.mxu0 %v1983_v10  ;;  %1906 = vmatprep.subr.bf16.mxu1 %v1983_v10  ;;  %v3510_v4 = vsel %vm2493_vm8, 4294967295, %v3509_v4  ;;  %vm2506_vm10 = vmand %vm3460_vm5, %vm2446_vm3  ;;  %3515 = vst [vmem:[#allocation25_spill] sm:$0xff] %v2526_v8  ;;  %vm3461_vm5 = vcmp.lt.s32.totalorder %v2540_v11, %v2426_v50 }
  0x55   : > { %813 = vperm.xlu1 %1980, %v781_v18   ;;  %810 = vperm.xlu0 %1979, %v780_v19   ;;  %vm2517_vm12 = vmand %vm3455_vm7, %vm2446_vm3  ;;  %3518 = vst [vmem:[#allocation26_spill] sm:$0xff] %v2540_v11  ;;  %v2576_v17 = vadd.s32 %v2414_v42, %v660_v9  ;;  %v658_v18 = vadd.s32 40, %v2405_v37 }
  0x56   : > { %vm2535_vm0 = vmand %vm3454_vm9, %vm2446_vm3  ;;  %vm3534_vm9 = vcmp.lt.s32.totalorder %v2526_v8, %v2426_v50 }
  0x57   : > { %vm2549_vm4 = vmand %vm3457_vm11, %vm2446_vm3  ;;  %3525 = vst [vmem:[#allocation27_spill] sm:$0xff] %v2576_v17 }
  0x58   : > { %vm2560_vm7 = vmand %vm3458_vm13, %vm2446_vm3 }
  0x59   : > { %819 = vperm.xlu1 %1980, %v783_v21   ;;  %816 = vperm.xlu0 %1979, %v782_v22   ;;  %vm2569_vm2 = vmand %vm3459_vm14, %vm2446_vm3 }
  0x5b   : > { %1877 = vmatpush3.bf16.xpose.msra.mxu0 %v1983_v10  ;;  %1914 = vmatpush3.bf16.xpose.msra.mxu1 %v1983_v10  ;;  %v2740_v10 = vadd.s32 %v2414_v42, %v666_v39 }
  0x5c   : > { %1878 = vmatprep.subr.bf16.mxu0 %v1984_v15  ;;  %1907 = vmatprep.subr.bf16.mxu1 %v1984_v15 }
  0x5d   : > { %825 = vperm.xlu1 %1980, %v785_v23   ;;  %822 = vperm.xlu0 %1979, %v784_v24   ;;  %v2600_v24 = vadd.s32 %v2414_v42, %v667_v14  ;;  %3557 = vst [vmem:[#allocation32_spill] sm:$0xff] %v2740_v10 }
  0x5f   : > { %3530 = vst [vmem:[#allocation28_spill] sm:$0xff] %v2600_v24 }
  0x63   : > { %1879 = vmatpush3.bf16.xpose.msra.mxu0 %v1984_v15  ;;  %1915 = vmatpush3.bf16.xpose.msra.mxu1 %v1984_v15 }
  0x64   : > { %1880 = vmatprep.subr.bf16.mxu0 %v1985_v20  ;;  %1908 = vmatprep.subr.bf16.mxu1 %v1985_v20 }
  0x6b   : > { %1881 = vmatpush3.bf16.xpose.msra.mxu0 %v1985_v20  ;;  %1916 = vmatpush3.bf16.xpose.msra.mxu1 %v1985_v20 }
  0x6c   : > { %1882 = vmatprep.subr.bf16.mxu0 %v1986_v25  ;;  %1909 = vmatprep.subr.bf16.mxu1 %v1986_v25 }
  0x73   : > { %1883 = vmatpush3.bf16.xpose.msra.mxu0 %v1986_v25  ;;  %1917 = vmatpush3.bf16.xpose.msra.mxu1 %v1986_v25  ;;  %v668_v25 = vadd.s32 120, %v2405_v37 }
  0x74   : > { %1884 = vmatprep.subr.bf16.mxu0 %v1987_v26  ;;  %1910 = vmatprep.subr.bf16.mxu1 %v1987_v26 }
  0x7b   : > { %1885 = vmatpush3.bf16.xpose.msra.mxu0 %v1987_v26  ;;  %1918 = vmatpush3.bf16.xpose.msra.mxu1 %v1987_v26 }
  0x7c   : > { %1886 = vmatprep.subr.bf16.mxu0 %v1988_v27  ;;  %1911 = vmatprep.subr.bf16.mxu1 %v1988_v27 }
  0x83   : > { %1887 = vmatpush3.bf16.xpose.msra.mxu0 %v1988_v27  ;;  %1919 = vmatpush3.bf16.xpose.msra.mxu1 %v1988_v27 }
  0x8a   : > { %1889 = vmatmul.mubr.bf16.vlgmr.msra.gmra.mxu0 %v1991_v28  ;;  %1897 = vmatmul.mubr.bf16.vlgmr.msra.gmra.mxu1 %v1992_v29 }
  0x8b   : > { %1892 = vmatprep.mubr.bf16.mxu0 %v1993_v30  ;;  %1900 = vmatprep.mubr.bf16.mxu1 %v1995_v31 }
  0x92   : > { %1893 = vmatmul.mubr.bf16.gmra.mxu0 %v1994_v32  ;;  %1901 = vmatmul.mubr.bf16.gmra.mxu1 %v1996_v33 }
  0xc4   : > { %v2402_v34 = vpop.permute.xlu0 %792  ;;  %v799_v36 = vpop.permute.xlu1 %798 }
  0xc5   : > { %vm845_vm15 = vcmp.eq.s32.totalorder %v799_v36, %v2486_v3  ;;  %vm843_vm1 = vcmp.eq.s32.totalorder %v2402_v34, %v2486_v3  ;;  %v665_v34 = vadd.s32 96, %v2405_v37  ;;  %v2649_v36 = vadd.s32 %v2414_v42, %v658_v18 }
  0xc6   : > { %vm2581_vm13 = vmand %vm845_vm15, %vm2474_vm6 }
  0xc7   : > { %vm2591_vm11 = vmand %vm843_vm1, %vm2506_vm10  ;;  %3539 = vst [vmem:[#allocation29_spill] sm:$0xff] %v2649_v36  ;;  %v2715_v2 = vadd.s32 %v2414_v42, %v665_v34 }
  0xc8   : > { %v2407_v38 = vpop.permute.xlu0 %795  ;;  %v2412_v41 = vpop.permute.xlu1 %801 }
  0xc9   : > { %3551 = vst [vmem:[#allocation31_spill] sm:$0xff] %v2715_v2 }
  0xcc   : > { %v2419_v46 = vpop.permute.xlu0 %804  ;;  %v2438_v56 = vpop.permute.xlu1 %807 }
  0xd0   : > { %v2458_v61 = vpop.permute.xlu0 %810  ;;  %v2499_v5 = vpop.permute.xlu1 %813 }
  0xd4   : > { %v817_v12 = vpop.permute.xlu0 %816  ;;  %v820_v20 = vpop.permute.xlu1 %819 }
  0xd5   : > { %vm3531_vm15 = vcmp.eq.s32.totalorder %v817_v12, %v2486_v3 }
  0xd6   : > { %vm2607_vm14 = vmand %vm3531_vm15, %vm2535_vm0 }
  0xd7   : > { %vm2626_vm15 = vmand %vm3534_vm9, %vm2446_vm3  ;;  %vm3541_vm9 = vcmp.eq.s32.totalorder %v2407_v38, %v2486_v3  ;;  %v2685_v38 = vadd.s32 %v2414_v42, %v668_v25 }
  0xd9   : > { %3544 = vst [vmem:[#allocation30_spill] sm:$0xff] %v2685_v38 }
 0x14a   : > { %v1890_v22 = vpop.f32.mrf.mxu0  ;;  %v2597_v23 = vpop.f32.mrf.mxu1 }
 0x14b   : > { %v2613_v27 = vsel %vm2474_vm6, %v1890_v22, -1e+30  ;;  %v2618_v28 = vsel %vm2493_vm8, %v2597_v23, -1e+30  ;;  %v2632_v30 = vsel %vm2581_vm13, %v1890_v22, 0.0  ;;  %vm2641_vm6 = vmand %vm3461_vm5, %vm2446_vm3  ;;  %vm3540_vm13 = vcmp.eq.s32.totalorder %v2412_v41, %v2486_v3 }
 0x14c   : > { %927 = vmax.xlane.f32.xlu1 %v2618_v28  ;;  %911 = vmax.xlane.f32.xlu0 %v2613_v27  ;;  %v588_v31 = vpop.f32.mrf.mxu0  ;;  %v620_v32 = vpop.f32.mrf.mxu1  ;;  %vm862_vm1 = vmand %vm3540_vm13, %vm2517_vm12  ;;  %vm849_vm5 = vcmp.eq.s32.totalorder %v2458_v61, %v2486_v3 }
 0x14d   : > { %v2661_v40 = vsel %vm2535_vm0, %v620_v32, -1e+30  ;;  %vm2668_vm8 = vmand %vm3541_vm9, %vm2549_vm4  ;;  %v2674_v41 = vsel %vm2591_vm11, %v588_v31, 0.0  ;;  %v2678_v44 = vsel %vm2607_vm14, %v620_v32, 0.0  ;;  %vm3545_vm9 = vcmp.eq.s32.totalorder %v820_v20, %v2486_v3 }
 0x14e   : > { %v1891_v45 = vpop.f32.mrf.mxu0  ;;  %v2680_v48 = vpop.f32.mrf.mxu1  ;;  %vm2691_vm13 = vmand %vm3545_vm9, %vm2569_vm2  ;;  %v2699_v52 = vsel %vm2506_vm10, %v588_v31, -1e+30  ;;  %vm3548_vm14 = vcmp.lt.s32.totalorder %v2576_v17, %v2426_v50  ;;  %vm696_vm10 = vcmp.lt.s32.totalorder %v2649_v36, %v2426_v50 }
 0x14f   : > { %vm2706_vm0 = vmand %vm3548_vm14, %vm2446_vm3  ;;  %v2710_v55 = vsel %vm862_vm1, %v1891_v45, 0.0  ;;  %vm850_vm1 = vcmp.eq.s32.totalorder %v2499_v5, %v2486_v3  ;;  %vm3554_vm14 = vcmp.lt.s32.totalorder %v2600_v24, %v2426_v50  ;;  %v2752_v14 = vsel %vm2517_vm12, %v1891_v45, -1e+30 }
 0x150   : > { %923 = vmax.xlane.f32.xlu1 %v2661_v40  ;;  %907 = vmax.xlane.f32.xlu0 %v2699_v52  ;;  %v591_v0 = vpop.f32.mrf.mxu0  ;;  %v623_v1 = vpop.f32.mrf.mxu1  ;;  %vm2724_vm9 = vmand %vm849_vm5, %vm2560_vm7  ;;  %vm3488_vm5 = vcmp.lt.s32.totalorder %v2685_v38, %v2426_v50  ;;  %vm848_vm12 = vcmp.eq.s32.totalorder %v2438_v56, %v2486_v3  ;;  %v2842_v49 = vsel %vm2641_vm6, %v2680_v48, -1e+30 }
 0x151   : > { %vm2735_vm11 = vmand %vm3554_vm14, %vm2446_vm3  ;;  %v2744_v61 = vsel %vm2668_vm8, %v591_v0, 0.0  ;;  %v2748_v12 = vsel %vm2691_vm13, %v623_v1, 0.0  ;;  %vm3558_vm8 = vcmp.eq.s32.totalorder %v2419_v46, %v2486_v3  ;;  %v2773_v7 = vsel %vm2549_vm4, %v591_v0, -1e+30  ;;  %v823_v38 = vpop.permute.xlu0 %822 }
 0x152   : > { %v1894_v18 = vpop.f32.mrf.mxu0  ;;  %v2754_v19 = vpop.f32.mrf.mxu1  ;;  %v1440_v42 = vadd.f32 %v2744_v61, %v2674_v41  ;;  %vm2765_vm13 = vmand %vm3558_vm8, %vm2626_vm15  ;;  %vm703_vm4 = vcmp.lt.s32.totalorder %v2715_v2, %v2426_v50 }
 0x153   : > { %v2777_v21 = vsel %vm2560_vm7, %v1894_v18, -1e+30  ;;  %vm2784_vm14 = vmand %vm696_vm10, %vm2446_vm3  ;;  %v2790_v22 = vsel %vm2724_vm9, %v1894_v18, 0.0  ;;  %v2863_v18 = vsel %vm2569_vm2, %v623_v1, -1e+30  ;;  %vm853_vm2 = vcmp.eq.s32.totalorder %v823_v38, %v2486_v3 }
 0x154   : > { %913 = vmax.xlane.f32.xlu0 %v2752_v14  ;;  %909 = vmax.xlane.f32.xlu1 %v2773_v7  ;;  %v604_v13 = vpop.f32.mrf.mxu0  ;;  %v2794_v15 = vpop.f32.mrf.mxu1  ;;  %vm2803_vm7 = vmand %vm850_vm1, %vm2706_vm0  ;;  %v1441_v26 = vadd.f32 %v1440_v42, %v2632_v30  ;;  %vm704_vm1 = vcmp.lt.s32.totalorder %v2740_v10, %v2426_v50  ;;  %v1330_v29 = vmax.f32 %v2613_v27, %v2777_v21  ;;  %v2900_v24 = vsel %vm2735_vm11, %v2754_v19, -1e+30 }
 0x155   : > { %v2810_v31 = vsel %vm2626_vm15, %v604_v13, -1e+30  ;;  %vm2817_vm9 = vmand %vm3488_vm5, %vm2446_vm3  ;;  %v2825_v5 = vsel %vm2765_vm13, %v604_v13, 0.0  ;;  %vm3571_vm13 = vnez %v3510_v4 }
 0x156   : > { %v1328_v34 = vmax.f32 %v2699_v52, %v2810_v31  ;;  %v1895_v39 = vpop.f32.mrf.mxu0  ;;  %v2831_v43 = vpop.f32.mrf.mxu1  ;;  %vm864_vm15 = vmand %vm848_vm12, %vm2784_vm14  ;;  %v1442_v45 = vadd.f32 %v1441_v26, %v2710_v55 }
 0x157   : > { %v2846_v0 = vsel %vm2706_vm0, %v1895_v39, -1e+30  ;;  %vm2853_vm8 = vmand %vm703_vm4, %vm2446_vm3  ;;  %v2859_v56 = vsel %vm2803_vm7, %v1895_v39, 0.0  ;;  %v2887_v1 = vsel %vm2817_vm9, %v2831_v43, -1e+30  ;;  %v1334_v39 = vmax.f32 %v1330_v29, %v2618_v28 }
 0x158   : > { %v1331_v54 = vmax.f32 %v2752_v14, %v2846_v0  ;;  %929 = vmax.xlane.f32.xlu0 %v2842_v49  ;;  %919 = vmax.xlane.f32.xlu1 %v2777_v21  ;;  %v607_v42 = vpop.f32.mrf.mxu0  ;;  %v2869_v20 = vpop.f32.mrf.mxu1  ;;  %vm2876_vm0 = vmand %vm704_vm1, %vm2446_vm3  ;;  %v1443_v26 = vadd.f32 %v1442_v45, %v2825_v5  ;;  %v1332_v35 = vmax.f32 %v1328_v34, %v2661_v40  ;;  %vm1211_vm7 = vcmask 7168  }
 0x159   : > { %v2882_v16 = vsel %vm2784_vm14, %v607_v42, -1e+30  ;;  %v2889_v25 = vsel %vm864_vm15, %v607_v42, 0.0  ;;  %v2905_v42 = vsel %vm2853_vm8, %v2794_v15, -1e+30  ;;  %v1338_v2 = vmax.f32 %v1334_v39, %v2900_v24  ;;  %vm869_vm12 = vmand %vm853_vm2, %vm3571_vm13 }
 0x15a   : > { %v1329_v58 = vmax.f32 %v2773_v7, %v2882_v16  ;;  %v1335_v46 = vmax.f32 %v1331_v54, %v2842_v49  ;;  %v2910_v29 = vsel %vm2876_vm0, %v2869_v20, -1e+30  ;;  %v1444_v34 = vadd.f32 %v1443_v26, %v2889_v25 }
 0x15b   : > { %v1336_v11 = vmax.f32 %v1332_v35, %v2905_v42  ;;  %v2930_v35 = vsel %vm869_vm12, %v2597_v23, 0.0  ;;  %v1359_v23 = vsub.s32 0, %v2405_v37 }
 0x15c   : > { %v1339_v45 = vmax.f32 %v1335_v46, %v2887_v1  ;;  %v1333_v54 = vmax.f32 %v1329_v58, %v2863_v18  ;;  %925 = vmax.xlane.f32.xlu0 %v2863_v18  ;;  %935 = vmax.xlane.f32.xlu1 %v2900_v24  ;;  %v1445_v10 = vadd.f32 %v1444_v34, %v2790_v22 }
 0x15e   : > { %v1337_v51 = vmax.f32 %v1333_v54, %v2910_v29  ;;  %v1446_v26 = vadd.f32 %v1445_v10, %v2859_v56  ;;  %v1341_v46 = vmax.f32 %v1338_v2, %v1339_v45  ;;  %v787_v54 = vld [vmem:[%s2307_s0 + $0x68] sm:$0xff] }
 0x160   : > { %v1340_v63 = vmax.f32 %v1336_v11, %v1337_v51  ;;  %915 = vmax.xlane.f32.xlu1 %v2810_v31  ;;  %v1447_v58 = vadd.f32 %v1446_v26, %v2678_v44  ;;  %v3572_v26 = vlaneseq }
 0x162   : > { %v1342_v38 = vmax.f32 %v1340_v63, %v1341_v46  ;;  %v1448_v39 = vadd.f32 %v1447_v58, %v2748_v12  ;;  %v2942_v63 = vld [vmem:[%s2939_s23] sm:$0x1]  ;;  %vm2947_vm14 = vcmp.lt.s32.totalorder %v3572_v26, 128 }
 0x164   : > { %v1343_v34 = vrot.slane %v1342_v38, 4  ;;  %931 = vmax.xlane.f32.xlu1 %v2905_v42  ;;  %v2933_v51 = vadd.f32 %v1448_v39, %v2930_v35  ;;  %v786_v39 = vld [vmem:[%s2307_s0 + $0x60] sm:$0xff] }
 0x166   : > { %v1344_v11 = vmax.f32 %v1342_v38, %v1343_v34 }
 0x168   : > { %v1345_v4 = vrot.slane %v1344_v11, 2 }
 0x16a   : > { %v1346_v2 = vmax.f32 %v1344_v11, %v1345_v4 }
 0x16c   : > { %v1347_v10 = vrot.slane %v1346_v2, 1 }
 0x16e   : > { %v1348_v45 = vmax.f32 %v1346_v2, %v1347_v10 }
 0x170   : > { %v2952_v58 = vmax.f32 %v2942_v63, %v1348_v45 }
 0x172   : > { %v2955_v38 = vrot.slane %v2952_v58, %v1359_v23  ;;  %831 = vperm.xlu0 %1979, %v787_v54   ;;  %1437 = vst.msk [vmem:[%s2939_s23] sm:$0x1] %vm2947_vm14, %v2952_v58 }
 0x174   : > { %v1362_v37 = vsub.f32 %v2699_v52, %v2955_v38  ;;  %v1363_v34 = vsub.f32 %v2773_v7, %v2955_v38  ;;  %v1364_v11 = vsub.f32 %v2613_v27, %v2955_v38  ;;  %v1365_v4 = vsub.f32 %v2752_v14, %v2955_v38 }
 0x175   : > { %828 = vperm.xlu1 %1980, %v786_v39   ;;  %v1366_v45 = vsub.f32 %v2810_v31, %v2955_v38  ;;  %v1367_v54 = vsub.f32 %v2882_v16, %v2955_v38  ;;  %v1368_v59 = vsub.f32 %v2777_v21, %v2955_v38  ;;  %v1369_v17 = vsub.f32 %v2846_v0, %v2955_v38 }
 0x176   : > { %v1378_v2 = vmul.f32 1.442695, %v1362_v37  ;;  %v1380_v10 = vmul.f32 1.442695, %v1363_v34  ;;  %v1382_v23 = vmul.f32 1.442695, %v1364_v11  ;;  %v1370_v34 = vsub.f32 %v2661_v40, %v2955_v38 }
 0x177   : > { %v1384_v26 = vmul.f32 1.442695, %v1365_v4  ;;  %v1386_v39 = vmul.f32 1.442695, %v1366_v45  ;;  %v1388_v37 = vmul.f32 1.442695, %v1367_v54  ;;  %v1376_v57 = vsub.f32 %v2900_v24, %v2955_v38 }
 0x178   : > { %1997 = vpow2.f32 %v1378_v2  ;;  %v1390_v11 = vmul.f32 1.442695, %v1368_v59  ;;  %v1371_v2 = vsub.f32 %v2863_v18, %v2955_v38  ;;  %v1392_v4 = vmul.f32 1.442695, %v1369_v17 }
 0x179   : > { %1999 = vpow2.f32 %v1380_v10  ;;  %v1372_v10 = vsub.f32 %v2618_v28, %v2955_v38  ;;  %v1394_v45 = vmul.f32 1.442695, %v1370_v34  ;;  %v1374_v59 = vsub.f32 %v2905_v42, %v2955_v38 }
 0x17a   : > { %2001 = vpow2.f32 %v1382_v23  ;;  %v1396_v54 = vmul.f32 1.442695, %v1371_v2  ;;  %v1375_v17 = vsub.f32 %v2910_v29, %v2955_v38  ;;  %v1406_v60 = vmul.f32 1.442695, %v1376_v57 }
 0x17b   : > { %2003 = vpow2.f32 %v1384_v26  ;;  %v1373_v26 = vsub.f32 %v2842_v49, %v2955_v38  ;;  %v1402_v2 = vmul.f32 1.442695, %v1374_v59 }
 0x17c   : > { %2005 = vpow2.f32 %v1386_v39  ;;  %v1398_v39 = vmul.f32 1.442695, %v1372_v10 }
 0x17d   : > { %2007 = vpow2.f32 %v1388_v37 }
 0x17e   : > { %2009 = vpow2.f32 %v1390_v11  ;;  %v1400_v11 = vmul.f32 1.442695, %v1373_v26 }
 0x17f   : > { %2011 = vpow2.f32 %v1392_v4 }
 0x180   : > { %2013 = vpow2.f32 %v1394_v45  ;;  %v1377_v45 = vsub.f32 %v2887_v1, %v2955_v38 }
 0x181   : > { %2015 = vpow2.f32 %v1396_v54 }
 0x182   : > { %2017 = vpow2.f32 %v1398_v39  ;;  %v1408_v26 = vmul.f32 1.442695, %v1377_v45 }
 0x183   : > { %2019 = vpow2.f32 %v1400_v11 }
 0x184   : > { %2021 = vpow2.f32 %v1402_v2 }
 0x185   : > { %v1998_v23 = vpop.eup %1997 }
 0x186   : > { %v2000_v62 = vpop.eup %1999 }
 0x187   : > { %v1410_v36 = vadd.f32 %v2000_v62, %v1998_v23  ;;  %v2002_v37 = vpop.eup %2001  ;;  %v1404_v62 = vmul.f32 1.442695, %v1375_v17 }
 0x188   : > { %v2004_v8 = vpop.eup %2003 }
 0x189   : > { %v1411_v34 = vadd.f32 %v2002_v37, %v1410_v36  ;;  %v2006_v47 = vpop.eup %2005  ;;  %2023 = vpow2.f32 %v1404_v62 }
 0x18a   : > { %v2008_v23 = vpop.eup %2007  ;;  %2025 = vpow2.f32 %v1406_v60 }
 0x18b   : > { %v1412_v4 = vadd.f32 %v2004_v8, %v1411_v34  ;;  %v2010_v36 = vpop.eup %2009  ;;  %2027 = vpow2.f32 %v1408_v26 }
 0x18c   : > { %v2012_v39 = vpop.eup %2011 }
 0x18d   : > { %v1413_v10 = vadd.f32 %v2006_v47, %v1412_v4  ;;  %v2014_v59 = vpop.eup %2013  ;;  %v1350_v47 = vsub.f32 %v2942_v63, %v2952_v58 }
 0x18e   : > { %v2016_v17 = vpop.eup %2015 }
 0x18f   : > { %v1414_v54 = vadd.f32 %v2008_v23, %v1413_v10  ;;  %v2018_v11 = vpop.eup %2017  ;;  %v1351_v4 = vmul.f32 1.442695, %v1350_v47 }
 0x190   : > { %v2020_v2 = vpop.eup %2019 }
 0x191   : > { %921 = vmax.xlane.f32.xlu0 %v2846_v0  ;;  %v1415_v37 = vadd.f32 %v2010_v36, %v1414_v54  ;;  %v2022_v60 = vpop.eup %2021  ;;  %2029 = vpow2.f32 %v1351_v4  ;;  %v3011_v4 = vld [vmem:[#allocation2 + $0x10] sm:$0xff] }
 0x193   : > { %v1416_v8 = vadd.f32 %v2012_v39, %v1415_v37 }
 0x195   : > { %937 = vmax.xlane.f32.xlu0 %v2887_v1  ;;  %v1417_v38 = vadd.f32 %v2014_v59, %v1416_v8 }
 0x196   : > { %v2024_v10 = vpop.eup %2023 }
 0x197   : > { %v1418_v57 = vadd.f32 %v2016_v17, %v1417_v38  ;;  %v2026_v54 = vpop.eup %2025  ;;  %v1354_v38 = vld [vmem:[%s3001_s24] sm:$0x1] }
 0x198   : > { %v2028_v26 = vpop.eup %2027 }
 0x199   : > { %917 = vmax.xlane.f32.xlu0 %v2882_v16  ;;  %v1419_v34 = vadd.f32 %v2018_v11, %v1418_v57 }
 0x19b   : > { %v1420_v45 = vadd.f32 %v2020_v2, %v1419_v34  ;;  %v3007_v34 = vpop.permute.xlu1 %825  ;;  %v3009_v2 = vld [vmem:[#allocation2 + $0x50] sm:$0xff] }
 0x19c   : > { %vm854_vm15 = vcmp.eq.s32.totalorder %v3007_v34, %v2486_v3 }
 0x19d   : > { %933 = vmax.xlane.f32.xlu0 %v2910_v29  ;;  %v1421_v62 = vadd.f32 %v2022_v60, %v1420_v45  ;;  %vm870_vm13 = vmand %vm854_vm15, %vm2641_vm6 }
 0x19e   : > { %v2030_v59 = vpop.eup %2029 }
 0x19f   : > { %v1422_v23 = vadd.f32 %v2024_v10, %v1421_v62  ;;  %v1355_v47 = vmul.f32 %v2030_v59, %v1354_v38  ;;  %v3040_v59 = vld [vmem:[#allocation2 + $0x8] sm:$0xff] }
 0x1a0   : > { %3575 = vst [vmem:[#allocation33_spill] sm:$0xff] %v3040_v59 }
 0x1a1   : > { %v1423_v36 = vadd.f32 %v2026_v54, %v1422_v23  ;;  %v3019_v23 = vld [vmem:[#allocation2 + $0x40] sm:$0xff] }
 0x1a2   : > { %v3021_v54 = vld [vmem:[#allocation2] sm:$0xff] }
 0x1a3   : > { %v1424_v63 = vadd.f32 %v2028_v26, %v1423_v36  ;;  %v3080_v26 = vld [vmem:[#allocation2 + $0x70] sm:$0xff] }
 0x1a5   : > { %v1425_v58 = vrot.slane %v1424_v63, 4 }
 0x1a7   : > { %v1426_v37 = vadd.f32 %v1425_v58, %v1424_v63 }
 0x1a9   : > { %v1427_v39 = vrot.slane %v1426_v37, 2 }
 0x1ab   : > { %v1428_v8 = vadd.f32 %v1427_v39, %v1426_v37 }
 0x1ad   : > { %v1429_v17 = vrot.slane %v1428_v8, 1 }
 0x1af   : > { %v1430_v57 = vadd.f32 %v1429_v17, %v1428_v8  ;;  %v3038_v8 = vld [vmem:[#allocation2 + $0x18] sm:$0xff]  ;;  %v3078_v17 = vld [vmem:[#allocation2 + $0x48] sm:$0xff] }
 0x1b1   : > { %v1431_v11 = vadd.f32 %v1430_v57, %v1355_v47 }
 0x1b3   : > { %1436 = vst.msk [vmem:[%s3001_s24] sm:$0x1] %vm2947_vm14, %v1431_v11 }
 0x1d5   : > { %v928_v45 = vpop.xlane.xlu1 %927  ;;  %v912_v60 = vpop.xlane.xlu0 %911 }
 0x1d6   : > { %v3014_v62 = vmax.f32 %v3009_v2, %v928_v45  ;;  %v3017_v10 = vmax.f32 %v3011_v4, %v912_v60  ;;  %v3058_v60 = vld [vmem:[#allocation2 + $0x58] sm:$0xff] }
 0x1d8   : > { %1238 = vst.msk [vmem:[#allocation2 + $0x50] sm:$0xff] %vm1211_vm7, %v3014_v62  ;;  %1230 = vst.msk [vmem:[#allocation2 + $0x10] sm:$0xff] %vm1211_vm7, %v3017_v10  ;;  %1047 = vperm.xlu0 %1979, %v3017_v10  }
 0x1d9   : > { %v924_v63 = vpop.xlane.xlu1 %923  ;;  %v908_v58 = vpop.xlane.xlu0 %907 }
 0x1da   : > { %v3033_v37 = vmax.f32 %v3019_v23, %v924_v63  ;;  %v3036_v39 = vmax.f32 %v3021_v54, %v908_v58  ;;  %v3060_v63 = vld [vmem:[#allocation2 + $0x30] sm:$0xff] }
 0x1db   : > { %3576 = vst [vmem:[#allocation34_spill] sm:$0xff] %v3060_v63 }
 0x1dc   : > { %1236 = vst.msk [vmem:[#allocation2 + $0x40] sm:$0xff] %vm1211_vm7, %v3033_v37  ;;  %1228 = vst.msk [vmem:[#allocation2] sm:$0xff] %vm1211_vm7, %v3036_v39  ;;  %1037 = vperm.xlu1 %1980, %v3036_v39   ;;  %1087 = vperm.xlu0 %1979, %v3014_v62  }
 0x1dd   : > { %v914_v47 = vpop.xlane.xlu0 %913  ;;  %v910_v57 = vpop.xlane.xlu1 %909 }
 0x1de   : > { %v3053_v11 = vmax.f32 %v3038_v8, %v914_v47  ;;  %v3056_v45 = vmax.f32 %v3040_v59, %v910_v57  ;;  %v3098_v59 = vld [vmem:[#allocation2 + $0x20] sm:$0xff] }
 0x1e0   : > { %1231 = vst.msk [vmem:[#allocation2 + $0x18] sm:$0xff] %vm1211_vm7, %v3053_v11  ;;  %1229 = vst.msk [vmem:[#allocation2 + $0x8] sm:$0xff] %vm1211_vm7, %v3056_v45  ;;  %1052 = vperm.xlu1 %1980, %v3053_v11   ;;  %1077 = vperm.xlu0 %1979, %v3033_v37   ;;  %v3586_v46 = vsub.f32 %v3038_v8, %v3053_v11  ;;  %v3589_v8 = vsub.f32 %v3019_v23, %v3033_v37 }
 0x1e1   : > { %v930_v47 = vpop.xlane.xlu0 %929  ;;  %v920_v57 = vpop.xlane.xlu1 %919 }
 0x1e2   : > { %v3073_v36 = vmax.f32 %v3058_v60, %v930_v47  ;;  %v3076_v58 = vmax.f32 %v3060_v63, %v920_v57  ;;  %v987_v11 = vmul.f32 1.442695, %v3589_v8 }
 0x1e4   : > { %3577 = vst [vmem:[#allocation35_spill] sm:$0xff] %v3076_v58  ;;  %1239 = vst.msk [vmem:[#allocation2 + $0x58] sm:$0xff] %vm1211_vm7, %v3073_v36  ;;  %1092 = vperm.xlu1 %1980, %v3073_v36   ;;  %1067 = vperm.xlu0 %1979, %v3076_v58  }
 0x1e5   : > { %1234 = vst.msk [vmem:[#allocation2 + $0x30] sm:$0xff] %vm1211_vm7, %v3076_v58  ;;  %v926_v47 = vpop.xlane.xlu0 %925  ;;  %v936_v57 = vpop.xlane.xlu1 %935  ;;  %v3113_v58 = vld [vmem:[#allocation2 + $0x60] sm:$0xff] }
 0x1e6   : > { %v3093_v53 = vmax.f32 %v3078_v17, %v926_v47  ;;  %v3096_v38 = vmax.f32 %v3080_v26, %v936_v57  ;;  %3580 = vst [vmem:[#allocation38_spill] sm:$0xff] %v3113_v58 }
 0x1e8   : > { %3578 = vst [vmem:[#allocation36_spill] sm:$0xff] %v3096_v38  ;;  %1237 = vst.msk [vmem:[#allocation2 + $0x48] sm:$0xff] %vm1211_vm7, %v3093_v53  ;;  %1042 = vperm.xlu1 %1980, %v3056_v45   ;;  %1107 = vperm.xlu0 %1979, %v3096_v38  }
 0x1e9   : > { %1242 = vst.msk [vmem:[#allocation2 + $0x70] sm:$0xff] %vm1211_vm7, %v3096_v38  ;;  %v916_v47 = vpop.xlane.xlu1 %915 }
 0x1ea   : > { %v3111_v57 = vmax.f32 %v3098_v59, %v916_v47 }
 0x1ec   : > { %3579 = vst [vmem:[#allocation37_spill] sm:$0xff] %v3111_v57  ;;  %1232 = vst.msk [vmem:[#allocation2 + $0x20] sm:$0xff] %vm1211_vm7, %v3111_v57  ;;  %1082 = vperm.xlu1 %1980, %v3093_v53   ;;  %1057 = vperm.xlu0 %1979, %v3111_v57   ;;  %v788_v57 = vld [vmem:[%s2307_s0 + $0x70] sm:$0xff] }
 0x1ed   : > { %v832_v50 = vpop.permute.xlu0 %831  ;;  %v932_v38 = vpop.xlane.xlu1 %931 }
 0x1ee   : > { %v3124_v47 = vmax.f32 %v3113_v58, %v932_v38  ;;  %vm856_vm2 = vcmp.eq.s32.totalorder %v832_v50, %v2486_v3  ;;  %v886_v38 = vsel %vm870_vm13, %v2680_v48, 0.0  ;;  %v3151_v48 = vld [vmem:[#allocation2 + $0x38] sm:$0xff] }
 0x1ef   : > { %vm872_vm5 = vmand %vm856_vm2, %vm2876_vm0  ;;  %v1450_v50 = vadd.f32 %v2933_v51, %v886_v38 }
 0x1f0   : > { %3581 = vst [vmem:[#allocation39_spill] sm:$0xff] %v3124_v47  ;;  %1240 = vst.msk [vmem:[#allocation2 + $0x60] sm:$0xff] %vm1211_vm7, %v3124_v47  ;;  %1097 = vperm.xlu0 %1979, %v3124_v47   ;;  %v888_v47 = vsel %vm872_vm5, %v2869_v20, 0.0  ;;  %v3168_v20 = vld [vmem:[#allocation2 + $0x28] sm:$0xff] }
 0x1f1   : > { %v829_v63 = vpop.permute.xlu1 %828 }
 0x1f2   : > { %vm855_vm12 = vcmp.eq.s32.totalorder %v829_v63, %v2486_v3 }
 0x1f3   : > { %vm871_vm6 = vmand %vm855_vm12, %vm2853_vm8 }
 0x1f4   : > { %834 = vperm.xlu0 %1979, %v788_v57   ;;  %v3143_v33 = vsel %vm871_vm6, %v2794_v15, 0.0  ;;  %v3157_v15 = vld [vmem:[#allocation2 + $0x78] sm:$0xff] }
 0x1f5   : > { %v1451_v34 = vadd.f32 %v1450_v50, %v3143_v33 }
 0x1f7   : > { %v3147_v58 = vadd.f32 %v1451_v34, %v888_v47  ;;  %v3178_v34 = vld [vmem:[#allocation2 + $0x68] sm:$0xff] }
 0x1f8   : > { %3582 = vst [vmem:[#allocation40_spill] sm:$0xff] %v3178_v34 }
 0x213   : > { %1262 = vadd.xlane.f32.xlu0 %v2744_v61 }
 0x217   : > { %1266 = vadd.xlane.f32.xlu0 %v2710_v55 }
 0x21a   : > { %v922_v6 = vpop.xlane.xlu0 %921 }
 0x21b   : > { %v3154_v13 = vmax.f32 %v3151_v48, %v922_v6  ;;  %1270 = vadd.xlane.f32.xlu0 %v2889_v25 }
 0x21d   : > { %1235 = vst.msk [vmem:[#allocation2 + $0x38] sm:$0xff] %vm1211_vm7, %v3154_v13  ;;  %1072 = vperm.xlu1 %1980, %v3154_v13  }
 0x21e   : > { %v938_v61 = vpop.xlane.xlu0 %937 }
 0x21f   : > { %v3165_v55 = vmax.f32 %v3157_v15, %v938_v61  ;;  %1274 = vadd.xlane.f32.xlu0 %v2859_v56 }
 0x221   : > { %1243 = vst.msk [vmem:[#allocation2 + $0x78] sm:$0xff] %vm1211_vm7, %v3165_v55 }
 0x222   : > { %v918_v63 = vpop.xlane.xlu0 %917 }
 0x223   : > { %v3175_v57 = vmax.f32 %v3168_v20, %v918_v63  ;;  %1278 = vadd.xlane.f32.xlu0 %v2748_v12  ;;  %v789_v12 = vld [vmem:[%s2307_s0 + $0x78] sm:$0xff]  ;;  %s3235_s0 = scalar_lea.vmem [#allocation7], %s2936_s15 }
 0x225   : > { %1233 = vst.msk [vmem:[#allocation2 + $0x28] sm:$0xff] %vm1211_vm7, %v3175_v57  ;;  %1062 = vperm.xlu1 %1980, %v3175_v57  }
 0x226   : > { %v934_v50 = vpop.xlane.xlu0 %933 }
 0x227   : > { %v3186_v6 = vmax.f32 %v3178_v34, %v934_v50  ;;  %1282 = vadd.xlane.f32.xlu0 %v886_v38 }
 0x229   : > { %3583 = vst [vmem:[#allocation41_spill] sm:$0xff] %v3186_v6  ;;  %1241 = vst.msk [vmem:[#allocation2 + $0x68] sm:$0xff] %vm1211_vm7, %v3186_v6  ;;  %1102 = vperm.xlu1 %1980, %v3186_v6  }
 0x22b   : > { %1286 = vadd.xlane.f32.xlu0 %v888_v47 }
 0x22d   : > { %1112 = vperm.xlu1 %1980, %v3165_v55  }
 0x231   : > { %837 = vperm.xlu1 %1980, %v789_v12  }
 0x253   : > { %v1048_v63 = vpop.permute.xlu0 %1047 }
 0x254   : > { %v1117_v56 = vsub.f32 %v2613_v27, %v1048_v63 }
 0x255   : > { %1260 = vadd.xlane.f32.xlu1 %v2674_v41 }
 0x256   : > { %v1135_v50 = vmul.f32 1.442695, %v1117_v56 }
 0x257   : > { %v1038_v38 = vpop.permute.xlu1 %1037  ;;  %v1088_v25 = vpop.permute.xlu0 %1087 }
 0x258   : > { %2031 = vpow2.f32 %v1135_v50  ;;  %v1115_v61 = vsub.f32 %v2699_v52, %v1038_v38  ;;  %v1125_v47 = vsub.f32 %v2618_v28, %v1088_v25 }
 0x259   : > { %1264 = vadd.xlane.f32.xlu1 %v2632_v30 }
 0x25a   : > { %v1131_v51 = vmul.f32 1.442695, %v1115_v61  ;;  %v1151_v41 = vmul.f32 1.442695, %v1125_v47 }
 0x25b   : > { %v1053_v6 = vpop.permute.xlu1 %1052  ;;  %v1078_v34 = vpop.permute.xlu0 %1077 }
 0x25c   : > { %2033 = vpow2.f32 %v1131_v51  ;;  %v1118_v12 = vsub.f32 %v2752_v14, %v1053_v6  ;;  %v1123_v56 = vsub.f32 %v2661_v40, %v1078_v34 }
 0x25d   : > { %1268 = vadd.xlane.f32.xlu1 %v2825_v5 }
 0x25e   : > { %v1137_v27 = vmul.f32 1.442695, %v1118_v12  ;;  %v1147_v28 = vmul.f32 1.442695, %v1123_v56 }
 0x25f   : > { %v1093_v63 = vpop.permute.xlu1 %1092  ;;  %v1068_v50 = vpop.permute.xlu0 %1067 }
 0x260   : > { %2035 = vpow2.f32 %v1137_v27  ;;  %v1126_v52 = vsub.f32 %v2842_v49, %v1093_v63  ;;  %v1121_v40 = vsub.f32 %v2777_v21, %v1068_v50 }
 0x261   : > { %1272 = vadd.xlane.f32.xlu1 %v2790_v22  ;;  %2037 = vpow2.f32 %v1151_v41 }
 0x262   : > { %v1153_v30 = vmul.f32 1.442695, %v1126_v52  ;;  %v1143_v47 = vmul.f32 1.442695, %v1121_v40 }
 0x263   : > { %v1043_v25 = vpop.permute.xlu1 %1042  ;;  %v1108_v51 = vpop.permute.xlu0 %1107 }
 0x264   : > { %2039 = vpow2.f32 %v1153_v30  ;;  %v1116_v14 = vsub.f32 %v2773_v7, %v1043_v25  ;;  %v1129_v7 = vsub.f32 %v2900_v24, %v1108_v51 }
 0x265   : > { %v2032_v5 = vpop.eup %2031  ;;  %1276 = vadd.xlane.f32.xlu1 %v2678_v44  ;;  %2041 = vpow2.f32 %v1147_v28 }
 0x266   : > { %1167 = vadd.xlane.f32.xlu0 %v2032_v5  ;;  %v1133_v34 = vmul.f32 1.442695, %v1116_v14  ;;  %v1159_v21 = vmul.f32 1.442695, %v1129_v7  ;;  %v1245_v5 = vld [vmem:[#allocation4 + $0x8] sm:$0xff] }
 0x267   : > { %v1083_v6 = vpop.permute.xlu1 %1082  ;;  %v1058_v38 = vpop.permute.xlu0 %1057 }
 0x268   : > { %v1124_v49 = vsub.f32 %v2863_v18, %v1083_v6  ;;  %2043 = vpow2.f32 %v1133_v34  ;;  %v1119_v12 = vsub.f32 %v2810_v31, %v1058_v38 }
 0x269   : > { %v2034_v22 = vpop.eup %2033  ;;  %1280 = vadd.xlane.f32.xlu1 %v2930_v35 }
 0x26a   : > { %v1149_v61 = vmul.f32 1.442695, %v1124_v49  ;;  %1163 = vadd.xlane.f32.xlu0 %v2034_v22  ;;  %v1139_v35 = vmul.f32 1.442695, %v1119_v12  ;;  %v1247_v49 = vld [vmem:[#allocation4 + $0x18] sm:$0xff] }
 0x26b   : > { %v1098_v27 = vpop.permute.xlu0 %1097 }
 0x26c   : > { %2045 = vpow2.f32 %v1149_v61  ;;  %v1127_v56 = vsub.f32 %v2905_v42, %v1098_v27 }
 0x26d   : > { %v2036_v44 = vpop.eup %2035  ;;  %1284 = vadd.xlane.f32.xlu1 %v3143_v33  ;;  %2047 = vpow2.f32 %v1143_v47  ;;  %v1249_v47 = vld [vmem:[#allocation4 + $0x28] sm:$0xff] }
 0x26e   : > { %1169 = vadd.xlane.f32.xlu0 %v2036_v44  ;;  %v2038_v18 = vpop.eup %2037  ;;  %2049 = vpow2.f32 %v1159_v21  ;;  %v1155_v24 = vmul.f32 1.442695, %v1127_v56  ;;  %v1251_v44 = vld [vmem:[#allocation4 + $0x38] sm:$0xff] }
 0x26f   : > { %2051 = vpow2.f32 %v1139_v35  ;;  %v835_v30 = vpop.permute.xlu0 %834  ;;  %v1253_v35 = vld [vmem:[#allocation4 + $0x48] sm:$0xff] }
 0x270   : > { %2053 = vpow2.f32 %v1155_v24  ;;  %vm857_vm5 = vcmp.eq.s32.totalorder %v835_v30, %v2486_v3 }
 0x271   : > { %v2040_v41 = vpop.eup %2039  ;;  %1183 = vadd.xlane.f32.xlu1 %v2038_v18  ;;  %vm873_vm8 = vmand %vm857_vm5, %vm2735_vm11 }
 0x272   : > { %1185 = vadd.xlane.f32.xlu0 %v2040_v41  ;;  %v2042_v63 = vpop.eup %2041  ;;  %v889_v42 = vsel %vm873_vm8, %v2754_v19, 0.0 }
 0x275   : > { %1179 = vadd.xlane.f32.xlu1 %v2042_v63  ;;  %v2044_v50 = vpop.eup %2043 }
 0x279   : > { %v2046_v33 = vpop.eup %2045  ;;  %1165 = vadd.xlane.f32.xlu1 %v2044_v50 }
 0x27a   : > { %1181 = vadd.xlane.f32.xlu0 %v2046_v33  ;;  %v2048_v52 = vpop.eup %2047 }
 0x27b   : > { %v2050_v31 = vpop.eup %2049 }
 0x27c   : > { %v2052_v28 = vpop.eup %2051 }
 0x27d   : > { %1175 = vadd.xlane.f32.xlu1 %v2048_v52  ;;  %v2054_v25 = vpop.eup %2053  ;;  %v1453_v52 = vadd.f32 %v3147_v58, %v889_v42 }
 0x281   : > { %1191 = vadd.xlane.f32.xlu1 %v2050_v31  ;;  %v1255_v31 = vld [vmem:[#allocation4 + $0x58] sm:$0xff] }
 0x285   : > { %1171 = vadd.xlane.f32.xlu1 %v2052_v28 }
 0x289   : > { %1187 = vadd.xlane.f32.xlu1 %v2054_v25 }
 0x28d   : > { %1288 = vadd.xlane.f32.xlu1 %v889_v42 }
 0x298   : > { %v1073_v14 = vpop.permute.xlu1 %1072 }
 0x299   : > { %v1122_v51 = vsub.f32 %v2846_v0, %v1073_v14  ;;  %v1257_v14 = vld [vmem:[#allocation4 + $0x68] sm:$0xff] }
 0x29b   : > { %v1145_v40 = vmul.f32 1.442695, %v1122_v51 }
 0x29c   : > { %v1263_v34 = vpop.xlane.xlu0 %1262 }
 0x29d   : > { %2055 = vpow2.f32 %v1145_v40  ;;  %v1293_v6 = vadd.f32 %v1263_v34, %v1245_v5  ;;  %v1439_v34 = vld [vmem:[%s3235_s0] sm:$0x1] }
 0x29f   : > { %1309 = vst.msk [vmem:[#allocation4 + $0x8] sm:$0xff] %vm1211_vm7, %v1293_v6 }
 0x2a0   : > { %v1063_v22 = vpop.permute.xlu1 %1062  ;;  %v1267_v61 = vpop.xlane.xlu0 %1266 }
 0x2a1   : > { %v1295_v38 = vadd.f32 %v1267_v61, %v1247_v49  ;;  %v1120_v0 = vsub.f32 %v2882_v16, %v1063_v22 }
 0x2a3   : > { %1311 = vst.msk [vmem:[#allocation4 + $0x18] sm:$0xff] %vm1211_vm7, %v1295_v38  ;;  %v1141_v63 = vmul.f32 1.442695, %v1120_v0  ;;  %v3584_v38 = vsub.f32 %v3011_v4, %v3017_v10  ;;  %v1248_v4 = vld [vmem:[#allocation4 + $0x20] sm:$0xff]  ;;  %v3587_v10 = vsub.f32 %v3009_v2, %v3014_v62 }
 0x2a4   : > { %v1103_v9 = vpop.permute.xlu1 %1102  ;;  %v1271_v19 = vpop.xlane.xlu0 %1270 }
 0x2a5   : > { %v1297_v7 = vadd.f32 %v1271_v19, %v1249_v47  ;;  %v1128_v33 = vsub.f32 %v2910_v29, %v1103_v9  ;;  %v975_v47 = vmul.f32 1.442695, %v3584_v38  ;;  %v1244_v9 = vld [vmem:[#allocation4] sm:$0xff]  ;;  %v3585_v19 = vsub.f32 %v3021_v54, %v3036_v39 }
 0x2a6   : > { %v3588_v54 = vsub.f32 %v3058_v60, %v3073_v36 }
 0x2a7   : > { %1313 = vst.msk [vmem:[#allocation4 + $0x28] sm:$0xff] %vm1211_vm7, %v1297_v7  ;;  %v1157_v25 = vmul.f32 1.442695, %v1128_v33  ;;  %v971_v7 = vmul.f32 1.442695, %v3585_v19  ;;  %v1252_v33 = vld [vmem:[#allocation4 + $0x40] sm:$0xff] }
 0x2a8   : > { %v1113_v21 = vpop.permute.xlu1 %1112  ;;  %v1275_v12 = vpop.xlane.xlu0 %1274  ;;  %v993_v39 = vmul.f32 1.442695, %v3588_v54 }
 0x2a9   : > { %v1130_v18 = vsub.f32 %v2887_v1, %v1113_v21  ;;  %v1299_v27 = vadd.f32 %v1275_v12, %v1251_v44  ;;  %v1246_v21 = vld [vmem:[#allocation4 + $0x10] sm:$0xff]  ;;  %v977_v12 = vmul.f32 1.442695, %v3586_v46  ;;  %v3598_v46 = vld [vmem:[#allocation37_spill] sm:$0xff] }
 0x2aa   : > { %v2056_v41 = vpop.eup %2055 }
 0x2ab   : > { %v1161_v56 = vmul.f32 1.442695, %v1130_v18  ;;  %1315 = vst.msk [vmem:[#allocation4 + $0x38] sm:$0xff] %vm1211_vm7, %v1299_v27  ;;  %1177 = vadd.xlane.f32.xlu0 %v2056_v41  ;;  %v991_v41 = vmul.f32 1.442695, %v3587_v10 }
 0x2ac   : > { %v838_v24 = vpop.permute.xlu1 %837  ;;  %v1279_v50 = vpop.xlane.xlu0 %1278 }
 0x2ad   : > { %2057 = vpow2.f32 %v1161_v56  ;;  %vm858_vm11 = vcmp.eq.s32.totalorder %v838_v24, %v2486_v3  ;;  %v1301_v16 = vadd.f32 %v1279_v50, %v1253_v35  ;;  %v1005_v50 = vld [vmem:[#allocation3 + $0x10] sm:$0xff] }
 0x2ae   : > { %vm874_vm0 = vmand %vm858_vm11, %vm2817_vm9  ;;  %2059 = vpow2.f32 %v1141_v63  ;;  %v1250_v63 = vld [vmem:[#allocation4 + $0x30] sm:$0xff] }
 0x2af   : > { %1317 = vst.msk [vmem:[#allocation4 + $0x48] sm:$0xff] %vm1211_vm7, %v1301_v16  ;;  %v890_v1 = vsel %vm874_vm0, %v2831_v43, 0.0  ;;  %2061 = vpow2.f32 %v1157_v25  ;;  %v3590_v16 = vld [vmem:[#allocation33_spill] sm:$0xff]  ;;  %v1003_v25 = vld [vmem:[#allocation3] sm:$0xff] }
 0x2b0   : > { %v1283_v30 = vpop.xlane.xlu0 %1282  ;;  %v1454_v28 = vadd.f32 %v1453_v52, %v890_v1  ;;  %2063 = vpow2.f32 %v975_v47  ;;  %v3591_v36 = vsub.f32 %v3590_v16, %v3056_v45  ;;  %v3592_v52 = vsub.f32 %v3078_v17, %v3093_v53  ;;  %v1012_v16 = vld [vmem:[#allocation3 + $0x48] sm:$0xff] }
 0x2b1   : > { %v1303_v29 = vadd.f32 %v1283_v30, %v1255_v31  ;;  %2065 = vpow2.f32 %v971_v7 }
 0x2b2   : > { %v1455_v51 = vrot.slane %v1454_v28, 4  ;;  %2067 = vpow2.f32 %v977_v12  ;;  %v973_v60 = vmul.f32 1.442695, %v3591_v36  ;;  %v989_v23 = vmul.f32 1.442695, %v3592_v52 }
 0x2b3   : > { %1319 = vst.msk [vmem:[#allocation4 + $0x58] sm:$0xff] %vm1211_vm7, %v1303_v29  ;;  %2069 = vpow2.f32 %v991_v41  ;;  %v3599_v12 = vsub.f32 %v3098_v59, %v3598_v46  ;;  %v1011_v41 = vld [vmem:[#allocation3 + $0x40] sm:$0xff] }
 0x2b4   : > { %v1287_v3 = vpop.xlane.xlu0 %1286  ;;  %v1456_v58 = vadd.f32 %v1455_v51, %v1454_v28  ;;  %2071 = vpow2.f32 %v993_v39  ;;  %v3593_v51 = vld [vmem:[#allocation34_spill] sm:$0xff] }
 0x2b5   : > { %v1305_v42 = vadd.f32 %v1287_v3, %v1257_v14  ;;  %2073 = vpow2.f32 %v987_v11  ;;  %v1254_v14 = vld [vmem:[#allocation4 + $0x50] sm:$0xff]  ;;  %v3594_v3 = vld [vmem:[#allocation35_spill] sm:$0xff] }
 0x2b6   : > { %v1457_v32 = vrot.slane %v1456_v58, 2  ;;  %2075 = vpow2.f32 %v973_v60 }
 0x2b7   : > { %1321 = vst.msk [vmem:[#allocation4 + $0x68] sm:$0xff] %vm1211_vm7, %v1305_v42  ;;  %2077 = vpow2.f32 %v989_v23 }
 0x2b8   : > { %v1458_v5 = vadd.f32 %v1457_v32, %v1456_v58  ;;  %v3595_v58 = vsub.f32 %v3593_v51, %v3594_v3 }
 0x2ba   : > { %v2058_v43 = vpop.eup %2057  ;;  %v1459_v40 = vrot.slane %v1458_v5, 1  ;;  %v983_v45 = vmul.f32 1.442695, %v3595_v58 }
 0x2bb   : > { %1193 = vadd.xlane.f32.xlu0 %v2058_v43  ;;  %v2060_v49 = vpop.eup %2059  ;;  %v1006_v43 = vld [vmem:[#allocation3 + $0x18] sm:$0xff] }
 0x2bc   : > { %v1460_v6 = vadd.f32 %v1459_v40, %v1458_v5  ;;  %v2062_v61 = vpop.eup %2061  ;;  %2079 = vpow2.f32 %v983_v45 }
 0x2bd   : > { %v2064_v62 = vpop.eup %2063 }
 0x2be   : > { %v1461_v22 = vadd.f32 %v1460_v6, %v1439_v34  ;;  %v1021_v31 = vmul.f32 %v2064_v62, %v1005_v50  ;;  %v1256_v34 = vld [vmem:[#allocation4 + $0x60] sm:$0xff]  ;;  %v3596_v6 = vld [vmem:[#allocation36_spill] sm:$0xff] }
 0x2bf   : > { %1173 = vadd.xlane.f32.xlu0 %v2060_v49  ;;  %v3597_v49 = vsub.f32 %v3080_v26, %v3596_v6 }
 0x2c0   : > { %1462 = vst.msk [vmem:[%s3235_s0] sm:$0x1] %vm2947_vm14, %v1461_v22 }
 0x2c1   : > { %v999_v22 = vmul.f32 1.442695, %v3597_v49 }
 0x2c3   : > { %1189 = vadd.xlane.f32.xlu0 %v2062_v61  ;;  %2081 = vpow2.f32 %v999_v22  ;;  %v1258_v22 = vld [vmem:[#allocation4 + $0x70] sm:$0xff] }
 0x2c7   : > { %1290 = vadd.xlane.f32.xlu0 %v890_v1  ;;  %v2066_v1 = vpop.eup %2065 }
 0x2c8   : > { %v1019_v17 = vmul.f32 %v2066_v1, %v1003_v25  ;;  %v2068_v42 = vpop.eup %2067 }
 0x2c9   : > { %v2070_v61 = vpop.eup %2069  ;;  %v1022_v47 = vmul.f32 %v2068_v42, %v1006_v43  ;;  %v1015_v43 = vld [vmem:[#allocation3 + $0x60] sm:$0xff] }
 0x2ca   : > { %v2072_v19 = vpop.eup %2071 }
 0x2de   : > { %v1261_v44 = vpop.xlane.xlu1 %1260 }
 0x2df   : > { %v1292_v0 = vadd.f32 %v1261_v44, %v1244_v9  ;;  %v1013_v9 = vld [vmem:[#allocation3 + $0x50] sm:$0xff] }
 0x2e0   : > { %v1029_v26 = vmul.f32 %v2070_v61, %v1013_v9 }
 0x2e1   : > { %1308 = vst.msk [vmem:[#allocation4] sm:$0xff] %vm1211_vm7, %v1292_v0  ;;  %v1014_v0 = vld [vmem:[#allocation3 + $0x58] sm:$0xff] }
 0x2e2   : > { %v1265_v18 = vpop.xlane.xlu1 %1264  ;;  %v1030_v10 = vmul.f32 %v2072_v19, %v1014_v0  ;;  %v3604_v19 = vsub.f32 %v3157_v15, %v3165_v55  ;;  %v1010_v0 = vld [vmem:[#allocation3 + $0x38] sm:$0xff] }
 0x2e3   : > { %v1294_v27 = vadd.f32 %v1265_v18, %v1246_v21  ;;  %v979_v18 = vmul.f32 1.442695, %v3599_v12  ;;  %v1018_v55 = vld [vmem:[#allocation3 + $0x78] sm:$0xff] }
 0x2e5   : > { %1310 = vst.msk [vmem:[#allocation4 + $0x10] sm:$0xff] %vm1211_vm7, %v1294_v27  ;;  %v2074_v27 = vpop.eup %2073  ;;  %2083 = vpow2.f32 %v979_v18 }
 0x2e6   : > { %v1269_v35 = vpop.xlane.xlu1 %1268  ;;  %v1027_v59 = vmul.f32 %v2074_v27, %v1011_v41  ;;  %v3606_v27 = vld [vmem:[#allocation40_spill] sm:$0xff] }
 0x2e7   : > { %v1296_v56 = vadd.f32 %v1269_v35, %v1248_v4 }
 0x2e9   : > { %1312 = vst.msk [vmem:[#allocation4 + $0x20] sm:$0xff] %vm1211_vm7, %v1296_v56  ;;  %v3600_v56 = vld [vmem:[#allocation38_spill] sm:$0xff] }
 0x2ea   : > { %v1273_v2 = vpop.xlane.xlu1 %1272 }
 0x2eb   : > { %v1298_v24 = vadd.f32 %v1273_v2, %v1250_v63  ;;  %v3601_v63 = vld [vmem:[#allocation39_spill] sm:$0xff]  ;;  %v2076_v2 = vpop.eup %2075 }
 0x2ec   : > { %v3602_v8 = vsub.f32 %v3600_v56, %v3601_v63  ;;  %v2078_v50 = vpop.eup %2077  ;;  %v1016_v63 = vld [vmem:[#allocation3 + $0x68] sm:$0xff] }
 0x2ed   : > { %1314 = vst.msk [vmem:[#allocation4 + $0x30] sm:$0xff] %vm1211_vm7, %v1298_v24  ;;  %v1004_v24 = vld [vmem:[#allocation3 + $0x8] sm:$0xff]  ;;  %v2080_v60 = vpop.eup %2079  ;;  %v1028_v23 = vmul.f32 %v2078_v50, %v1012_v16 }
 0x2ee   : > { %v1277_v37 = vpop.xlane.xlu1 %1276  ;;  %v995_v11 = vmul.f32 1.442695, %v3602_v8  ;;  %v1020_v36 = vmul.f32 %v2076_v2, %v1004_v24  ;;  %v2082_v25 = vpop.eup %2081 }
 0x2ef   : > { %v1300_v30 = vadd.f32 %v1277_v37, %v1252_v33  ;;  %v1168_v28 = vpop.xlane.xlu0 %1167  ;;  %v1009_v37 = vld [vmem:[#allocation3 + $0x30] sm:$0xff] }
 0x2f0   : > { %v1197_v29 = vadd.f32 %v1168_v28, %v1021_v31  ;;  %2085 = vpow2.f32 %v995_v11  ;;  %v1025_v28 = vmul.f32 %v2080_v60, %v1009_v37 }
 0x2f1   : > { %1316 = vst.msk [vmem:[#allocation4 + $0x40] sm:$0xff] %vm1211_vm7, %v1300_v30 }
 0x2f2   : > { %1214 = vst.msk [vmem:[#allocation3 + $0x10] sm:$0xff] %vm1211_vm7, %v1197_v29  ;;  %v1281_v53 = vpop.xlane.xlu1 %1280  ;;  %v2084_v58 = vpop.eup %2083 }
 0x2f3   : > { %v1302_v32 = vadd.f32 %v1281_v53, %v1254_v14  ;;  %v1164_v5 = vpop.xlane.xlu0 %1163  ;;  %v1017_v14 = vld [vmem:[#allocation3 + $0x70] sm:$0xff]  ;;  %v1007_v53 = vld [vmem:[#allocation3 + $0x20] sm:$0xff] }
 0x2f4   : > { %v1195_v40 = vadd.f32 %v1164_v5, %v1019_v17  ;;  %v1033_v3 = vmul.f32 %v2082_v25, %v1017_v14  ;;  %v1023_v42 = vmul.f32 %v2084_v58, %v1007_v53 }
 0x2f5   : > { %1318 = vst.msk [vmem:[#allocation4 + $0x50] sm:$0xff] %vm1211_vm7, %v1302_v32 }
 0x2f6   : > { %1212 = vst.msk [vmem:[#allocation3] sm:$0xff] %vm1211_vm7, %v1195_v40  ;;  %v1285_v38 = vpop.xlane.xlu1 %1284 }
 0x2f7   : > { %v1304_v7 = vadd.f32 %v1285_v38, %v1256_v34  ;;  %v1170_v44 = vpop.xlane.xlu0 %1169 }
 0x2f8   : > { %v1198_v21 = vadd.f32 %v1170_v44, %v1022_v47  ;;  %v3603_v47 = vsub.f32 %v3151_v48, %v3154_v13 }
 0x2f9   : > { %1320 = vst.msk [vmem:[#allocation4 + $0x60] sm:$0xff] %vm1211_vm7, %v1304_v7  ;;  %v1001_v7 = vmul.f32 1.442695, %v3604_v19 }
 0x2fa   : > { %1215 = vst.msk [vmem:[#allocation3 + $0x18] sm:$0xff] %vm1211_vm7, %v1198_v21  ;;  %v1184_v4 = vpop.xlane.xlu1 %1183  ;;  %v985_v9 = vmul.f32 1.442695, %v3603_v47  ;;  %v3605_v21 = vsub.f32 %v3168_v20, %v3175_v57 }
 0x2fb   : > { %v1205_v54 = vadd.f32 %v1184_v4, %v1029_v26  ;;  %v1186_v39 = vpop.xlane.xlu0 %1185  ;;  %v3607_v4 = vld [vmem:[#allocation41_spill] sm:$0xff] }
 0x2fc   : > { %v1206_v35 = vadd.f32 %v1186_v39, %v1030_v10  ;;  %2087 = vpow2.f32 %v985_v9  ;;  %v981_v46 = vmul.f32 1.442695, %v3605_v21  ;;  %v3608_v48 = vsub.f32 %v3606_v27, %v3607_v4  ;;  %v1008_v39 = vld [vmem:[#allocation3 + $0x28] sm:$0xff] }
 0x2fd   : > { %1222 = vst.msk [vmem:[#allocation3 + $0x50] sm:$0xff] %vm1211_vm7, %v1205_v54  ;;  %v2086_v32 = vpop.eup %2085  ;;  %2089 = vpow2.f32 %v1001_v7 }
 0x2fe   : > { %1223 = vst.msk [vmem:[#allocation3 + $0x58] sm:$0xff] %vm1211_vm7, %v1206_v35  ;;  %v1180_v62 = vpop.xlane.xlu1 %1179  ;;  %v1031_v34 = vmul.f32 %v2086_v32, %v1015_v43  ;;  %2091 = vpow2.f32 %v981_v46  ;;  %v997_v13 = vmul.f32 1.442695, %v3608_v48 }
 0x2ff   : > { %v1203_v33 = vadd.f32 %v1180_v62, %v1027_v59  ;;  %v1259_v62 = vld [vmem:[#allocation4 + $0x78] sm:$0xff] }
 0x300   : > { %2093 = vpow2.f32 %v997_v13 }
 0x301   : > { %1220 = vst.msk [vmem:[#allocation3 + $0x40] sm:$0xff] %vm1211_vm7, %v1203_v33 }
 0x302   : > { %v1166_v52 = vpop.xlane.xlu1 %1165 }
 0x303   : > { %v1196_v31 = vadd.f32 %v1166_v52, %v1020_v36  ;;  %v1182_v1 = vpop.xlane.xlu0 %1181 }
 0x304   : > { %v1204_v30 = vadd.f32 %v1182_v1, %v1028_v23 }
 0x305   : > { %1213 = vst.msk [vmem:[#allocation3 + $0x8] sm:$0xff] %vm1211_vm7, %v1196_v31 }
 0x306   : > { %1221 = vst.msk [vmem:[#allocation3 + $0x48] sm:$0xff] %vm1211_vm7, %v1204_v30  ;;  %v1176_v29 = vpop.xlane.xlu1 %1175 }
 0x307   : > { %v1201_v51 = vadd.f32 %v1176_v29, %v1025_v28 }
 0x309   : > { %1218 = vst.msk [vmem:[#allocation3 + $0x30] sm:$0xff] %vm1211_vm7, %v1201_v51  ;;  %v2088_v44 = vpop.eup %2087 }
 0x30a   : > { %v1192_v45 = vpop.xlane.xlu1 %1191  ;;  %v1026_v12 = vmul.f32 %v2088_v44, %v1010_v0  ;;  %v2090_v15 = vpop.eup %2089 }
 0x30b   : > { %v1209_v17 = vadd.f32 %v1192_v45, %v1033_v3  ;;  %v1034_v10 = vmul.f32 %v2090_v15, %v1018_v55  ;;  %v2092_v41 = vpop.eup %2091 }
 0x30c   : > { %v1024_v20 = vmul.f32 %v2092_v41, %v1008_v39 }
 0x30d   : > { %1226 = vst.msk [vmem:[#allocation3 + $0x70] sm:$0xff] %vm1211_vm7, %v1209_v17  ;;  %v2094_v57 = vpop.eup %2093 }
 0x30e   : > { %v1172_v5 = vpop.xlane.xlu1 %1171  ;;  %v1032_v11 = vmul.f32 %v2094_v57, %v1016_v63 }
 0x30f   : > { %v1199_v40 = vadd.f32 %v1172_v5, %v1023_v42 }
 0x311   : > { %1216 = vst.msk [vmem:[#allocation3 + $0x20] sm:$0xff] %vm1211_vm7, %v1199_v40 }
 0x312   : > { %v1188_v6 = vpop.xlane.xlu1 %1187 }
 0x313   : > { %v1207_v49 = vadd.f32 %v1188_v6, %v1031_v34 }
 0x315   : > { %1224 = vst.msk [vmem:[#allocation3 + $0x60] sm:$0xff] %vm1211_vm7, %v1207_v49 }
 0x316   : > { %v1289_v61 = vpop.xlane.xlu1 %1288 }
 0x317   : > { %v1306_v38 = vadd.f32 %v1289_v61, %v1258_v22 }
 0x319   : > { %1322 = vst.msk [vmem:[#allocation4 + $0x70] sm:$0xff] %vm1211_vm7, %v1306_v38 }
 0x334   : > { %v1178_v18 = vpop.xlane.xlu0 %1177 }
 0x335   : > { %v1202_v26 = vadd.f32 %v1178_v18, %v1026_v12 }
 0x337   : > { %1219 = vst.msk [vmem:[#allocation3 + $0x38] sm:$0xff] %vm1211_vm7, %v1202_v26 }
 0x344   : > { %v1194_v54 = vpop.xlane.xlu0 %1193 }
 0x345   : > { %v1210_v35 = vadd.f32 %v1194_v54, %v1034_v10 }
 0x347   : > { %1227 = vst.msk [vmem:[#allocation3 + $0x78] sm:$0xff] %vm1211_vm7, %v1210_v35 }
 0x348   : > { %v1174_v56 = vpop.xlane.xlu0 %1173 }
 0x349   : > { %v1200_v8 = vadd.f32 %v1174_v56, %v1024_v20 }
 0x34b   : > { %1217 = vst.msk [vmem:[#allocation3 + $0x28] sm:$0xff] %vm1211_vm7, %v1200_v8 }
 0x34c   : > { %v1190_v59 = vpop.xlane.xlu0 %1189 }
 0x34d   : > { %v1208_v2 = vadd.f32 %v1190_v59, %v1032_v11 }
 0x34f   : > { %1225 = vst.msk [vmem:[#allocation3 + $0x68] sm:$0xff] %vm1211_vm7, %v1208_v2  ;;  %1466 = sbr.rel (%p1850_p12) target bundleno = 1112 (0x458), region = 60 }
 0x350   : > { %v1291_v24 = vpop.xlane.xlu0 %1290 }
 0x351   : > { %v1307_v50 = vadd.f32 %v1291_v24, %v1259_v62 }
 0x353   : > { %1323 = vst.msk [vmem:[#allocation4 + $0x78] sm:$0xff] %vm1211_vm7, %v1307_v50 }
 0x354   : > { %v1483_v33 = vld [vmem:[#allocation3] sm:$0xff]  ;;  %v1484_v16 = vld [vmem:[#allocation3 + $0x8] sm:$0xff]  ;;  %v1485_v36 = vld [vmem:[#allocation3 + $0x10] sm:$0xff] }
 0x355   : > { %v1486_v60 = vld [vmem:[#allocation3 + $0x18] sm:$0xff]  ;;  %2095 = vlog2.f32 %v1483_v33  ;;  %v1487_v52 = vld [vmem:[#allocation3 + $0x20] sm:$0xff]  ;;  %v1488_v23 = vld [vmem:[#allocation3 + $0x28] sm:$0xff] }
 0x356   : > { %2097 = vlog2.f32 %v1484_v16  ;;  %v1489_v37 = vld [vmem:[#allocation3 + $0x30] sm:$0xff]  ;;  %v1490_v31 = vld [vmem:[#allocation3 + $0x38] sm:$0xff]  ;;  %v1491_v1 = vld [vmem:[#allocation3 + $0x40] sm:$0xff] }
 0x357   : > { %2099 = vlog2.f32 %v1485_v36  ;;  %v1492_v30 = vld [vmem:[#allocation3 + $0x48] sm:$0xff]  ;;  %v1493_v28 = vld [vmem:[#allocation3 + $0x50] sm:$0xff]  ;;  %v1494_v14 = vld [vmem:[#allocation3 + $0x58] sm:$0xff] }
 0x358   : > { %2101 = vlog2.f32 %v1486_v60  ;;  %v1467_v3 = vld [vmem:[#allocation2] sm:$0xff]  ;;  %v1468_v58 = vld [vmem:[#allocation2 + $0x8] sm:$0xff]  ;;  %v1469_v40 = vld [vmem:[#allocation2 + $0x10] sm:$0xff] }
 0x359   : > { %2103 = vlog2.f32 %v1487_v52  ;;  %v1495_v17 = vld [vmem:[#allocation3 + $0x60] sm:$0xff]  ;;  %v1548_v6 = vld [vmem:[#allocation4 + $0x8] sm:$0xff]  ;;  %v1549_v38 = vld [vmem:[#allocation4 + $0x10] sm:$0xff] }
 0x35a   : > { %2105 = vlog2.f32 %v1488_v23  ;;  %v1547_v32 = vld [vmem:[#allocation4] sm:$0xff]  ;;  %v1564_v49 = vld [vmem:[%s2312_s13 + $0x8] sm:$0xff]  ;;  %v1565_v47 = vld [vmem:[%s2312_s13 + $0x10] sm:$0xff] }
 0x35b   : > { %2107 = vlog2.f32 %v1489_v37  ;;  %v1563_v5 = vld [vmem:[%s2312_s13] sm:$0xff]  ;;  %v1496_v22 = vld [vmem:[#allocation3 + $0x68] sm:$0xff]  ;;  %v1470_v19 = vld [vmem:[#allocation2 + $0x18] sm:$0xff]  ;;  %v1580_v26 = vmul.f32 %v1564_v49, %v1548_v6  ;;  %v1581_v55 = vmul.f32 %v1565_v47, %v1549_v38 }
 0x35c   : > { %2109 = vlog2.f32 %v1490_v31  ;;  %v1550_v44 = vld [vmem:[#allocation4 + $0x18] sm:$0xff]  ;;  %v1579_v21 = vmul.f32 %v1563_v5, %v1547_v32  ;;  %v1497_v46 = vld [vmem:[#allocation3 + $0x70] sm:$0xff]  ;;  %v1471_v4 = vld [vmem:[#allocation2 + $0x20] sm:$0xff] }
 0x35d   : > { %2111 = vlog2.f32 %v1491_v1  ;;  %v1566_v0 = vld [vmem:[%s2312_s13 + $0x18] sm:$0xff]  ;;  %v1551_v13 = vld [vmem:[#allocation4 + $0x20] sm:$0xff]  ;;  %v1472_v20 = vld [vmem:[#allocation2 + $0x28] sm:$0xff] }
 0x35e   : > { %2113 = vlog2.f32 %v1492_v30  ;;  %v1567_v15 = vld [vmem:[%s2312_s13 + $0x20] sm:$0xff]  ;;  %v1498_v10 = vld [vmem:[#allocation3 + $0x78] sm:$0xff]  ;;  %v1582_v39 = vmul.f32 %v1566_v0, %v1550_v44  ;;  %v1552_v57 = vld [vmem:[#allocation4 + $0x28] sm:$0xff] }
 0x35f   : > { %2115 = vlog2.f32 %v1493_v28  ;;  %v1568_v56 = vld [vmem:[%s2312_s13 + $0x28] sm:$0xff]  ;;  %v1583_v2 = vmul.f32 %v1567_v15, %v1551_v13  ;;  %v1473_v24 = vld [vmem:[#allocation2 + $0x30] sm:$0xff]  ;;  %v1554_v23 = vld [vmem:[#allocation4 + $0x38] sm:$0xff] }
 0x360   : > { %2117 = vlog2.f32 %v1494_v14  ;;  %v1553_v50 = vld [vmem:[#allocation4 + $0x30] sm:$0xff]  ;;  %v1570_v37 = vld [vmem:[%s2312_s13 + $0x38] sm:$0xff]  ;;  %v1584_v31 = vmul.f32 %v1568_v56, %v1552_v57  ;;  %v3612_v32 = vld [vmem:[#allocation22_spill] sm:$0xff] }
 0x361   : > { %2119 = vlog2.f32 %v1495_v17  ;;  %v1569_v33 = vld [vmem:[%s2312_s13 + $0x30] sm:$0xff]  ;;  %v1474_v30 = vld [vmem:[#allocation2 + $0x38] sm:$0xff]  ;;  %v1572_v38 = vld [vmem:[%s2312_s13 + $0x48] sm:$0xff] }
 0x362   : > { %v2096_v25 = vpop.eup %2095  ;;  %2121 = vlog2.f32 %v1496_v22  ;;  %v1585_v17 = vmul.f32 %v1569_v33, %v1553_v50  ;;  %v1476_v44 = vld [vmem:[#allocation2 + $0x48] sm:$0xff]  ;;  %v1558_v57 = vld [vmem:[#allocation4 + $0x58] sm:$0xff] }
 0x363   : > { %v2098_v29 = vpop.eup %2097  ;;  %v1500_v45 = vmul.f32 0.6931472, %v2096_v25  ;;  %2123 = vlog2.f32 %v1497_v46  ;;  %v3609_v25 = vld [vmem:[#allocation18_spill] sm:$0xff]  ;;  %v1574_v56 = vld [vmem:[%s2312_s13 + $0x58] sm:$0xff] }
 0x364   : > { %v2100_v51 = vpop.eup %2099  ;;  %v1502_v42 = vmul.f32 0.6931472, %v2098_v29  ;;  %2125 = vlog2.f32 %v1498_v10  ;;  %v3610_v29 = vld [vmem:[#allocation16_spill] sm:$0xff] }
 0x365   : > { %v2102_v53 = vpop.eup %2101  ;;  %v1504_v34 = vmul.f32 0.6931472, %v2100_v51  ;;  %v1531_v7 = vadd.f32 %v1500_v45, %v1467_v3  ;;  %vm3611_vm9 = vcmp.lt.s32.totalorder %v3609_v25, %v3610_v29  ;;  %v1475_v3 = vld [vmem:[#allocation2 + $0x40] sm:$0xff]  ;;  %vm3613_vm14 = vcmp.lt.s32.totalorder %v3612_v32, %v3610_v29  ;;  %v1477_v10 = vld [vmem:[#allocation2 + $0x50] sm:$0xff]  ;;  %v1480_v32 = vld [vmem:[#allocation2 + $0x68] sm:$0xff] }
 0x366   : > { %v2104_v43 = vpop.eup %2103  ;;  %v1506_v61 = vmul.f32 0.6931472, %v2102_v53  ;;  %v1532_v18 = vadd.f32 %v1502_v42, %v1468_v58  ;;  %v1555_v45 = vld [vmem:[#allocation4 + $0x40] sm:$0xff] }
 0x367   : > { %v2106_v9 = vpop.eup %2105  ;;  %v1508_v12 = vmul.f32 0.6931472, %v2104_v43  ;;  %v1533_v48 = vadd.f32 %v1504_v34, %v1469_v40  ;;  %v1595_v63 = vsub.f32 %v1531_v7, %v1579_v21  ;;  %v1571_v53 = vld [vmem:[%s2312_s13 + $0x40] sm:$0xff]  ;;  %v1586_v40 = vmul.f32 %v1570_v37, %v1554_v23  ;;  %v3614_v34 = vld [vmem:[#allocation15_spill] sm:$0xff] }
 0x368   : > { %v2108_v27 = vpop.eup %2107  ;;  %v1510_v41 = vmul.f32 0.6931472, %v2106_v9  ;;  %v1534_v54 = vadd.f32 %v1506_v61, %v1470_v19  ;;  %v1596_v62 = vsub.f32 %v1532_v18, %v1580_v26  ;;  %vm3615_vm15 = vcmp.lt.s32.totalorder %v3614_v34, %v3610_v29  ;;  %v1556_v61 = vld [vmem:[#allocation4 + $0x48] sm:$0xff]  ;;  %v1557_v26 = vld [vmem:[#allocation4 + $0x50] sm:$0xff] }
 0x369   : > { %v2110_v35 = vpop.eup %2109  ;;  %v1512_v11 = vmul.f32 0.6931472, %v2108_v27  ;;  %v1535_v59 = vadd.f32 %v1508_v12, %v1471_v4  ;;  %v1597_v16 = vsub.f32 %v1533_v48, %v1581_v55  ;;  %v1612_v14 = vsel %vm3611_vm9, %v1595_v63, 0.0  ;;  %v3616_v9 = vld [vmem:[#allocation19_spill] sm:$0xff]  ;;  %v1573_v27 = vld [vmem:[%s2312_s13 + $0x50] sm:$0xff]  ;;  %v3618_v48 = vld [vmem:[#allocation25_spill] sm:$0xff] }
 0x36a   : > { %v2112_v8 = vpop.eup %2111  ;;  %v1514_v60 = vmul.f32 0.6931472, %v2110_v35  ;;  %v1536_v52 = vadd.f32 %v1510_v41, %v1472_v20  ;;  %v1598_v1 = vsub.f32 %v1534_v54, %v1582_v39  ;;  %v1613_v5 = vsel %vm3613_vm14, %v1596_v62, 0.0  ;;  %v3621_v23 = vld [vmem:[#allocation23_spill] sm:$0xff] }
 0x36b   : > { %v2114_v36 = vpop.eup %2113  ;;  %v1516_v28 = vmul.f32 0.6931472, %v2112_v8  ;;  %v1537_v58 = vadd.f32 %v1512_v11, %v1473_v24  ;;  %v1599_v42 = vsub.f32 %v1535_v59, %v1583_v2  ;;  %v1614_v6 = vsel %vm3615_vm15, %v1597_v16, 0.0  ;;  %v1478_v2 = vld [vmem:[#allocation2 + $0x58] sm:$0xff] }
 0x36c   : > { %v2116_v51 = vpop.eup %2115  ;;  %v1518_v43 = vmul.f32 0.6931472, %v2114_v36  ;;  %v1538_v22 = vadd.f32 %v1514_v60, %v1474_v30  ;;  %v1600_v47 = vsub.f32 %v1536_v52, %v1584_v31  ;;  %vm3617_vm2 = vcmp.lt.s32.totalorder %v3616_v9, %v3610_v29  ;;  %v1559_v36 = vld [vmem:[#allocation4 + $0x60] sm:$0xff]  ;;  %v1481_v9 = vld [vmem:[#allocation2 + $0x70] sm:$0xff] }
 0x36d   : > { %v2118_v49 = vpop.eup %2117  ;;  %v1615_v19 = vsel %vm3617_vm2, %v1598_v1, 0.0  ;;  %v1628_v7 = vsel %vm1211_vm7, %v1612_v14, 0.0  ;;  %v1520_v0 = vmul.f32 0.6931472, %v2116_v51  ;;  %v1539_v21 = vadd.f32 %v1516_v28, %v1475_v3  ;;  %v1575_v60 = vld [vmem:[%s2312_s13 + $0x60] sm:$0xff]  ;;  %v1560_v3 = vld [vmem:[#allocation4 + $0x68] sm:$0xff] }
 0x36e   : > { %v1587_v46 = vmul.f32 %v1571_v53, %v1555_v45  ;;  %v1629_v12 = vsel %vm1211_vm7, %v1613_v5, 0.0  ;;  %v2120_v18 = vpop.eup %2119  ;;  %v1601_v4 = vsub.f32 %v1537_v58, %v1585_v17  ;;  %vm3619_vm13 = vcmp.lt.s32.totalorder %v3618_v48, %v3610_v29  ;;  %v1479_v1 = vld [vmem:[#allocation2 + $0x60] sm:$0xff]  ;;  %v1576_v58 = vld [vmem:[%s2312_s13 + $0x68] sm:$0xff] }
 0x36f   : > { %v1616_v13 = vsel %vm3619_vm13, %v1599_v42, 0.0  ;;  %v1630_v15 = vadd.f32 %v1629_v12, %v1628_v7  ;;  %v1631_v55 = vsel %vm1211_vm7, %v1614_v6, 0.0  ;;  %v1522_v41 = vmul.f32 0.6931472, %v2118_v49  ;;  %v2122_v35 = vpop.eup %2121  ;;  %v3623_v53 = vld [vmem:[#allocation27_spill] sm:$0xff]  ;;  %v1561_v6 = vld [vmem:[#allocation4 + $0x70] sm:$0xff] }
 0x370   : > { %v1588_v54 = vmul.f32 %v1572_v38, %v1556_v61  ;;  %v1633_v39 = vsel %vm1211_vm7, %v1615_v19, 0.0  ;;  %v1540_v20 = vadd.f32 %v1518_v43, %v1476_v44  ;;  %v1602_v63 = vsub.f32 %v1538_v22, %v1586_v40  ;;  %v2124_v33 = vpop.eup %2123  ;;  %v1577_v49 = vld [vmem:[%s2312_s13 + $0x70] sm:$0xff]  ;;  %v3625_v61 = vld [vmem:[#allocation21_spill] sm:$0xff] }
 0x371   : > { %v1617_v11 = vsel %vm696_vm10, %v1600_v47, 0.0  ;;  %v1632_v59 = vadd.f32 %v1631_v55, %v1630_v15  ;;  %v1524_v62 = vmul.f32 0.6931472, %v2120_v18  ;;  %v1589_v24 = vmul.f32 %v1573_v27, %v1557_v26  ;;  %v2126_v14 = vpop.eup %2125  ;;  %v3627_v18 = vld [vmem:[#allocation24_spill] sm:$0xff] }
 0x372   : > { %v1635_v50 = vsel %vm1211_vm7, %v1616_v13, 0.0  ;;  %v1541_v16 = vadd.f32 %v1520_v0, %v1477_v10  ;;  %v1603_v52 = vsub.f32 %v1539_v21, %v1587_v46  ;;  %vm3622_vm12 = vcmp.lt.s32.totalorder %v3621_v23, %v3610_v29  ;;  %v1562_v21 = vld [vmem:[#allocation4 + $0x78] sm:$0xff]  ;;  %v3635_v23 = vld [vmem:[#allocation28_spill] sm:$0xff] }
 0x373   : > { %v1618_v37 = vsel %vm3622_vm12, %v1601_v4, 0.0  ;;  %v1634_v31 = vadd.f32 %v1633_v39, %v1632_v59  ;;  %v1526_v30 = vmul.f32 0.6931472, %v2122_v35  ;;  %v1590_v28 = vmul.f32 %v1574_v56, %v1558_v57  ;;  %v1578_v46 = vld [vmem:[%s2312_s13 + $0x78] sm:$0xff]  ;;  %v3631_v56 = vld [vmem:[#allocation26_spill] sm:$0xff] }
 0x374   : > { %v1637_v25 = vsel %vm1211_vm7, %v1617_v11, 0.0  ;;  %v1542_v51 = vadd.f32 %v1522_v41, %v1478_v2  ;;  %v1604_v45 = vsub.f32 %v1540_v20, %v1588_v54  ;;  %vm3624_vm10 = vcmp.lt.s32.totalorder %v3623_v53, %v3610_v29  ;;  %v1482_v4 = vld [vmem:[#allocation2 + $0x78] sm:$0xff] }
 0x375   : > { %v1619_v17 = vsel %vm3624_vm10, %v1602_v63, 0.0  ;;  %v1636_v42 = vadd.f32 %v1635_v50, %v1634_v31  ;;  %v1528_v5 = vmul.f32 0.6931472, %v2124_v33  ;;  %v1591_v43 = vmul.f32 %v1575_v60, %v1559_v36  ;;  %v3629_v10 = vld [vmem:[#allocation17_spill] sm:$0xff] }
 0x376   : > { %v1639_v40 = vsel %vm1211_vm7, %v1618_v37, 0.0  ;;  %v1543_v34 = vadd.f32 %v1524_v62, %v1479_v1  ;;  %v1605_v22 = vsub.f32 %v1541_v16, %v1589_v24  ;;  %vm3626_vm6 = vcmp.lt.s32.totalorder %v3625_v61, %v3610_v29 }
 0x377   : > { %v1620_v38 = vsel %vm3626_vm6, %v1603_v52, 0.0  ;;  %v1638_v47 = vadd.f32 %v1637_v25, %v1636_v42  ;;  %v1530_v19 = vmul.f32 0.6931472, %v2126_v14  ;;  %v1592_v7 = vmul.f32 %v1576_v58, %v1560_v3 }
 0x378   : > { %v1641_v44 = vsel %vm1211_vm7, %v1619_v17, 0.0  ;;  %v1544_v0 = vadd.f32 %v1526_v30, %v1480_v32  ;;  %v1606_v12 = vsub.f32 %v1542_v51, %v1590_v28  ;;  %vm3628_vm5 = vcmp.lt.s32.totalorder %v3627_v18, %v3610_v29  ;;  %v3637_v30 = vld [vmem:[#allocation30_spill] sm:$0xff] }
 0x379   : > { %v1621_v26 = vsel %vm3628_vm5, %v1604_v45, 0.0  ;;  %v1640_v27 = vadd.f32 %v1639_v40, %v1638_v47  ;;  %v1593_v48 = vmul.f32 %v1577_v49, %v1561_v6  ;;  %v1643_v13 = vsel %vm1211_vm7, %v1620_v38, 0.0 }
 0x37a   : > { %v1545_v15 = vadd.f32 %v1528_v5, %v1481_v9  ;;  %v1607_v55 = vsub.f32 %v1543_v34, %v1591_v43  ;;  %vm3630_vm8 = vcmp.lt.s32.totalorder %v3629_v10, %v3610_v29  ;;  %v1594_v39 = vmul.f32 %v1578_v46, %v1562_v21 }
 0x37b   : > { %v1622_v41 = vsel %vm3630_vm8, %v1605_v22, 0.0  ;;  %v1642_v54 = vadd.f32 %v1641_v44, %v1640_v27  ;;  %v1645_v35 = vsel %vm1211_vm7, %v1621_v26, 0.0  ;;  %v1546_v20 = vadd.f32 %v1530_v19, %v1482_v4 }
 0x37c   : > { %v1608_v57 = vsub.f32 %v1544_v0, %v1592_v7  ;;  %vm3632_vm11 = vcmp.lt.s32.totalorder %v3631_v56, %v3610_v29  ;;  %v1647_v11 = vsel %vm1211_vm7, %v1622_v41, 0.0  ;;  %v1609_v59 = vsub.f32 %v1545_v15, %v1593_v48 }
 0x37d   : > { %v1623_v63 = vsel %vm3632_vm11, %v1606_v12, 0.0  ;;  %v1644_v8 = vadd.f32 %v1643_v13, %v1642_v54  ;;  %v1624_v62 = vsel %vm703_vm4, %v1607_v55, 0.0  ;;  %v1610_v33 = vsub.f32 %v1546_v20, %v1594_v39 }
 0x37e   : > { %v1649_v50 = vsel %vm1211_vm7, %v1623_v63, 0.0  ;;  %v1625_v36 = vsel %vm704_vm1, %v1608_v57, 0.0  ;;  %v1651_v52 = vsel %vm1211_vm7, %v1624_v62, 0.0  ;;  %vm3636_vm0 = vcmp.lt.s32.totalorder %v3635_v23, %v3610_v29 }
 0x37f   : > { %v1646_v24 = vadd.f32 %v1645_v35, %v1644_v8  ;;  %v1626_v37 = vsel %vm3636_vm0, %v1609_v59, 0.0  ;;  %v1653_v1 = vsel %vm1211_vm7, %v1625_v36, 0.0  ;;  %vm3638_vm4 = vcmp.lt.s32.totalorder %v3637_v30, %v3610_v29 }
 0x380   : > { %v1627_v28 = vsel %vm3638_vm4, %v1610_v33, 0.0  ;;  %v1655_v14 = vsel %vm1211_vm7, %v1626_v37, 0.0 }
 0x381   : > { %v1648_v60 = vadd.f32 %v1647_v11, %v1646_v24  ;;  %v1657_v3 = vsel %vm1211_vm7, %v1627_v28, 0.0 }
 0x383   : > { %v1650_v31 = vadd.f32 %v1649_v50, %v1648_v60 }
 0x385   : > { %v1652_v25 = vadd.f32 %v1651_v52, %v1650_v31 }
 0x387   : > { %v1654_v51 = vadd.f32 %v1653_v1, %v1652_v25 }
 0x389   : > { %v1656_v58 = vadd.f32 %v1655_v14, %v1654_v51 }
 0x38b   : > { %v1658_v45 = vadd.f32 %v1657_v3, %v1656_v58 }
 0x38d   : > { %1659 = vadd.xlane.f32.xlu0 %v1658_v45 }
 0x416   : > { %v1660_v53 = vpop.xlane.xlu0 %1659 }
 0x417   : > { %v1661_v17 = vrot.slane %v1660_v53, 4 }
 0x419   : > { %v1662_v42 = vadd.f32 %v1661_v17, %v1660_v53 }
 0x41b   : > { %v1663_v32 = vrot.slane %v1662_v42, 2 }
 0x41d   : > { %v1664_v5 = vadd.f32 %v1663_v32, %v1662_v42 }
 0x41f   : > { %v1665_v43 = vrot.slane %v1664_v5, 1 }
 0x421   : > { %v1666_v40 = vadd.f32 %v1665_v43, %v1664_v5 }
 0x423   : > { %1920 = vpush %v1666_v40 }
 0x454   : > { %s1921_s13 = spop %1920 }
 0x455   : > { %s1668_s14 = sadd.f32 %s1921_s13, %s1611_s25 }
 0x457   : > { %1670 = sst [smem:[#allocation8]] %s1668_s14 }
 0x458 PF: > { %p1671_p13 = scmp.eq.s32.totalorder %s2185_s27, 1  ;;  %p1851_p0 = scmp.ne.s32.totalorder %s2185_s27, 1 }
 0x459   : > { %s1684_s12 = sld [smem:[#allocation8]] (!%p1851_p0) }
 0x45a   : > { %1674 = sbr.rel (%p1851_p0) target bundleno = 1345 (0x541), region = 64 }
 0x45f   : > { %v1676_v29 = vld [vmem:[%s3001_s24] sm:$0x1]  ;;  %vm1686_vm1 = vcmask 1040384  }
 0x460   : > { %2127 = vlog2.f32 %v1676_v29  ;;  %v1680_v34 = vld [vmem:[%s3235_s0] sm:$0x1] }
 0x461   : > { %v1681_v6 = vld [vmem:[%s351_s18] sm:$0x1] }
 0x462   : > { %v1675_v22 = vld [vmem:[%s2939_s23] sm:$0x1]  ;;  %v1682_v38 = vmul.f32 %v1681_v6, %v1680_v34 }
 0x46d   : > { %v2128_v49 = vpop.eup %2127 }
 0x46e   : > { %v1678_v61 = vmul.f32 0.6931472, %v2128_v49 }
 0x470   : > { %v1679_v47 = vadd.f32 %v1678_v61, %v1675_v22 }
 0x472   : > { %v1683_v9 = vsub.f32 %v1679_v47, %v1682_v38 }
 0x474   : > { %v1685_v7 = vsel %vm2446_vm3, %v1683_v9, 0.0 }
 0x475   : > { %v1687_v44 = vsel %vm1686_vm1, %v1685_v7, 0.0 }
 0x476   : > { %1688 = vadd.xlane.f32.xlu0 %v1687_v44 }
 0x4ff   : > { %v1689_v0 = vpop.xlane.xlu0 %1688 }
 0x500   : > { %v1690_v21 = vrot.slane %v1689_v0, 4 }
 0x502   : > { %v1691_v46 = vadd.f32 %v1690_v21, %v1689_v0 }
 0x504   : > { %v1692_v12 = vrot.slane %v1691_v46, 2 }
 0x506   : > { %v1693_v18 = vadd.f32 %v1692_v12, %v1691_v46 }
 0x508   : > { %v1694_v26 = vrot.slane %v1693_v18, 1 }
 0x50a   : > { %v1695_v27 = vadd.f32 %v1694_v26, %v1693_v18 }
 0x50c   : > { %1922 = vpush %v1695_v27 }
 0x53d   : > { %s1923_s18 = spop %1922 }
 0x53e   : > { %s1697_s9 = sadd.f32 %s1923_s18, %s1684_s12 }
 0x540   : > { %1699 = sst [smem:[#allocation8]] %s1697_s9 }
 0x541 PF: > { %p1700_p1 = pnand %p1671_p13, %p1463_p11 }
 0x542   : > { %s1706_s16 = scvt.s32.f32 (!%p1700_p1), %s2286_s11  ;;  %s1704_s17 = sld [smem:[#allocation8]] (!%p1700_p1) }
 0x543   : > { %1703 = sbr.rel (%p1700_p1) target bundleno = 1421 (0x58d), region = 68 }
 0x548   : > { %v1707_v4 = vstv %s1706_s16  ;;  %s1705_s19 = smul.f32 0.5, %s1704_s17  ;;  %vm1712_vm3 = vcmask 0  }
 0x549   : > { %2129 = vrcp.f32 %v1707_v4 }
 0x556   : > { %v2130_v48 = vpop.eup %2129 }
 0x557   : > { %1924 = vpush %v2130_v48 }
 0x588   : > { %s1925_s20 = spop %1924 }
 0x589   : > { %s1710_s21 = smul.f32 %s1925_s20, %s1705_s19 }
 0x58b   : > { %v1711_v13 = vstv %s1710_s21 }
 0x58c   : > { %1713 = vst.msk [vmem:[#allocation10] sm:$0x1] %vm1712_vm3, %v1711_v13 }
 0x58d PF: > { %s3640_s26 = sadd.s32 4294967295, %s2197_s30   ;;  %s2205_s11 = smov [#allocation10]  }
 0x58e   : > { %p3415_p2 = scmp.eq.s32.totalorder %s3640_s26, 3  ;;  %s1721_s22 = sshll.u32 %s2205_s11, 4  ;;  %s1722_s22 = int_to_ptr.vmem [resolvable:$true] %s1721_s22 }
 0x58f   : > { %s2131_s15 = scalar_lea.vmem %s1722_s22, 16  ;;  %s2137_s23 = scalar_lea.vmem %s1722_s22, 32 }
 0x590   : > { %p2132_p3 = scmp.ne.s32.totalorder %s1722_s22, %s2131_s15  ;;  %p2138_p6 = scmp.lt.s32.totalorder %s1722_s22, %s1722_s22 }
 0x591   : > { %p2139_p7 = scmp.lt.s32.totalorder %s2137_s23, %s2131_s15 }
 0x592   : > { %p2133_p4 = pnand %p2132_p3, %p3415_p2 }
 0x593   : > { %p2140_p8 = por %p2139_p7, %p2138_p6 }
 0x594   : > { %p2134_p5 = pneg %p2133_p4 }
 0x596   : > { %p2141_p9 = pnand %p2140_p8, %p2134_p5 }
 0x598   : > { %2144 = shalt.err (!%p2141_p9)
}
 0x599   : > { %1927 = dma.vmem_to_hbm [thread:$0]  (%p3415_p2), %s1722_s22, 16, %s3452_s7, [#allocation11]  }
 0x59a   : > { %2176 = dma.done.wait (%p3415_p2), [#allocation11], 16  }
 0x59b   : > { %2178 = vsyncadd (%p3415_p2), [#allocation11], 4294967280 }
 0x59c PF: > { %s19_s30 = sadd.s32 1, %s2197_s30   ;;  %s3642_s25 = sld [smem:[#allocation13_spill]] }
 0x59d   : > { %p16_p10 = scmp.ge.s32.totalorder %s19_s30, 6   ;;  %s3643_s13 = sld [smem:[#allocation14_spill]] }
 0x59e   : > { %s3644_s26 = smov %s2189_s28  ;;  %s3645_s27 = smov %s2193_s29 }
 0x59f   :  { %18 = sbr.rel (!%p16_p10) target bundleno = 5 (0x5), region = 114 }
 0x5a2   : > { %s3646_s28 = smov %s3642_s25 }
 0x5a3   : > { %s3647_s29 = smov %s3643_s13 }
 0x5a4   :  { %1734 = vsyncpa [#allocation11], 1 }
 0x5a5   :  { %1736 = vsyncpa [#allocation11 + $0x1], 1 }

</bundles_post_ra>
